<compile_context>
chip_gen: v7x
topology: tpu7x:2x2x1
jax: 0.10.0
libtpu: 0.0.40
codegen_flags: <defaults>
</compile_context>

<pallas_src>
import jax
import jax.numpy as jnp
from jax.experimental import pallas as pl
from jax.experimental.pallas import tpu as pltpu


def _round_up(v, m):
    return (v + m - 1) // m * m


def _ceil_div(a, b):
    return -(-a // b)


def _vmem_capacity_bytes():
    """Detected per-core VMEM capacity; conservative 64 MiB (v7x) fallback."""
    try:
        info = pltpu.get_tpu_info()
        for name in ("vmem_capacity_bytes", "vmem_size_bytes", "vmem_bytes"):
            v = getattr(info, name, None)
            if isinstance(v, int) and v > 0:
                return v
    except Exception:
        pass
    return 64 * 1024 * 1024


def _choose_time_block(T, Bt, in_pad, H_pad, budget_bytes, cap_tt=128):
    """Largest Tt whose pipelined VMEM footprint fits budget_bytes, then
    rebalanced so T pads up as little as possible."""
    four_h = 4 * H_pad
    # Tt-independent bytes: double-buffered weights/bias/lengths, double-
    # buffered h/c outputs, h/c scratch (all f32).
    fixed = 4 * (2 * (in_pad * four_h + H_pad * four_h + four_h + Bt)
                 + 4 * Bt * H_pad + 2 * Bt * H_pad)
    # Per-Tt bytes: x block (2 buf) + out block (2 buf) + gx scratch (1 buf).
    per_tt = 4 * Bt * (2 * in_pad + 2 * H_pad + four_h)
    avail = max(budget_bytes - fixed, per_tt)
    tt = int(max(1, min(cap_tt, avail // per_tt)))
    # Spread T evenly over ceil(T/tt) blocks to minimize time padding.
    n_blocks = _ceil_div(T, tt)
    return int(_ceil_div(T, n_blocks))


# --------------------------------------------------------------------------
# Fused per-layer kernel: hoisted input projection + sequential recurrence.
# grid = (batch_blocks, time_blocks); time is "arbitrary" (sequential),
# batch is "parallel".
# --------------------------------------------------------------------------
def _lstm_layer_kernel(x_ref, w_ih_ref, w_hh_ref, b_ref, len_ref,
                       out_ref, h_out_ref, c_out_ref,
                       gx_sc, h_sc, c_sc):
    """One (batch_block, time_block) tile of a fused LSTM layer.

    x_ref   : (Tt, Bt, in_pad)   layer input for these timesteps
    w_ih_ref: (in_pad, 4*Hp)     pre-transposed input->hidden weights (resident)
    w_hh_ref: (Hp, 4*Hp)         pre-transposed hidden->hidden weights (resident)
    b_ref   : (1, 4*Hp)          combined bias
    len_ref : (Bt, 1)            int32 sequence lengths
    out_ref : (Tt, Bt, Hp)       per-timestep outputs (zero past length)
    h_out_ref/c_out_ref: (Bt, Hp) final states (constant block index over time
        -> written back only once, at the end of this batch block; correct
        because the time axis is "arbitrary" and we store on the last t step)
    gx_sc   : (Tt, Bt, 4*Hp)     VMEM scratch for the hoisted projection
    h_sc/c_sc: (Bt, Hp)          VMEM scratch carrying state across time blocks
    """
    t_idx = pl.program_id(1)
    Tt, Bt, in_pad = x_ref.shape
    Hp = h_sc.shape[1]

    @pl.when(t_idx == 0)
    def _():
        h_sc[...] = jnp.zeros_like(h_sc)
        c_sc[...] = jnp.zeros_like(c_sc)

    # --- fused, hoisted input projection: one lane-dense MXU matmul covering
    # all Tt timesteps of this tile (no gates_x HBM round trip). ---
    x2d = x_ref[...].reshape(Tt * Bt, in_pad)
    gx_sc[...] = (jnp.dot(x2d, w_ih_ref[...],
                          preferred_element_type=jnp.float32)
                  + b_ref[...]).reshape(Tt, Bt, 4 * Hp)

    w_hh = w_hh_ref[...]          # loaded once per tile, reused every step
    lengths = len_ref[...]        # (Bt, 1) int32, hoisted out of the loop
    t0 = t_idx * Tt

    def step(tl, carry):
        h, c = carry
        # Only the recurrent matmul + gate math remain in the hot loop.
        gates = gx_sc[tl] + jnp.dot(h, w_hh,
                                    preferred_element_type=jnp.float32)
        # Gate slices are Hp-wide at Hp-aligned (multiple-of-128) offsets.
        i_g = jax.nn.sigmoid(gates[:, 0:Hp])
        f_g = jax.nn.sigmoid(gates[:, Hp:2 * Hp])
        g_g = jnp.tanh(gates[:, 2 * Hp:3 * Hp])
        o_g = jax.nn.sigmoid(gates[:, 3 * Hp:4 * Hp])

        c_new = f_g * c + i_g * g_g
        h_new = o_g * jnp.tanh(c_new)

        valid = (t0 + tl) < lengths                    # (Bt, 1) bool
        out_ref[tl] = jnp.where(valid, h_new, 0.0)     # zero-pad past length
        return (jnp.where(valid, h_new, h), jnp.where(valid, c_new, c))

    # Fixed partial unroll: keeps LLO scheduling visibility for any Tt without
    # inflating vreg pressure at large Hp.
    h_fin, c_fin = jax.lax.fori_loop(
        0, Tt, step, (h_sc[...], c_sc[...]), unroll=min(8, Tt))

    h_sc[...] = h_fin
    c_sc[...] = c_fin

    @pl.when(t_idx == pl.num_programs(1) - 1)
    def _():
        h_out_ref[...] = h_fin
        c_out_ref[...] = c_fin


def lstm_layer_pallas(x_pad, w_ih_t, w_hh_t, b_t, lengths2, Tt, Bt, vmem_limit):
    """x_pad: [T_pad, B_pad, in_pad] -> (out [T_pad,B_pad,H_pad], h, c)."""
    T_pad, B_pad, in_pad = x_pad.shape
    H_pad = w_hh_t.shape[0]
    four_h = 4 * H_pad
    grid = (B_pad // Bt, T_pad // Tt)

    flops = int(2 * T_pad * B_pad * four_h * (in_pad + H_pad))
    transcendentals = int(5 * T_pad * B_pad * H_pad)
    bytes_accessed = int(4 * (T_pad * B_pad * (in_pad + H_pad)
                              + (in_pad + H_pad) * four_h
                              + four_h + B_pad + 2 * B_pad * H_pad))

    grid_spec = pltpu.PrefetchScalarGridSpec(
        num_scalar_prefetch=0,
        grid=grid,
        in_specs=[
            pl.BlockSpec((Tt, Bt, in_pad), lambda b, t: (t, b, 0)),
            # Constant-index blocks: Pallas skips re-DMA across grid steps, so
            # the weights stay resident in VMEM for the whole call.
            pl.BlockSpec((in_pad, four_h), lambda b, t: (0, 0)),
            pl.BlockSpec((H_pad, four_h), lambda b, t: (0, 0)),
            pl.BlockSpec((1, four_h), lambda b, t: (0, 0)),
            pl.BlockSpec((Bt, 1), lambda b, t: (b, 0)),
        ],
        out_specs=(
            pl.BlockSpec((Tt, Bt, H_pad), lambda b, t: (t, b, 0)),
            pl.BlockSpec((Bt, H_pad), lambda b, t: (b, 0)),
            pl.BlockSpec((Bt, H_pad), lambda b, t: (b, 0)),
        ),
        scratch_shapes=[
            pltpu.VMEM((Tt, Bt, four_h), jnp.float32),   # hoisted gates_x tile
            pltpu.VMEM((Bt, H_pad), jnp.float32),        # h carry
            pltpu.VMEM((Bt, H_pad), jnp.float32),        # c carry
        ],
    )
    out_shapes = (
        jax.ShapeDtypeStruct((T_pad, B_pad, H_pad), jnp.float32),
        jax.ShapeDtypeStruct((B_pad, H_pad), jnp.float32),
        jax.ShapeDtypeStruct((B_pad, H_pad), jnp.float32),
    )
    return pl.pallas_call(
        _lstm_layer_kernel,
        out_shape=out_shapes,
        grid_spec=grid_spec,
        compiler_params=pltpu.CompilerParams(
            # batch axis "parallel" -> megacore may split the batch (only
            # enabled for large B by the wrapper); time must stay sequential.
            dimension_semantics=("parallel", "arbitrary"),
            vmem_limit_bytes=int(vmem_limit)),
        cost_estimate=pl.CostEstimate(flops=flops,
                                      transcendentals=transcendentals,
                                      bytes_accessed=bytes_accessed),
    )(x_pad, w_ih_t, w_hh_t, b_t, lengths2)


# --------------------------------------------------------------------------
# Weight preparation: pre-transpose + pad to lane/sublane-aligned, gate-major
# layout so gate k lives in columns [k*H_pad, (k+1)*H_pad).
# --------------------------------------------------------------------------
def _prep_lstm_weights(w_ih, w_hh, b, in_pad, H_pad):
    four_h, in_dim = w_ih.shape
    H = four_h // 4

    w_ih4 = jnp.pad(w_ih.reshape(4, H, in_dim),
                    ((0, 0), (0, H_pad - H), (0, in_pad - in_dim)))
    w_ih_t = jnp.transpose(w_ih4, (2, 0, 1)).reshape(in_pad, 4 * H_pad)

    w_hh4 = jnp.pad(w_hh.reshape(4, H, H),
                    ((0, 0), (0, H_pad - H), (0, H_pad - H)))
    w_hh_t = jnp.transpose(w_hh4, (2, 0, 1)).reshape(H_pad, 4 * H_pad)

    b4 = jnp.pad(b.reshape(4, H), ((0, 0), (0, H_pad - H)))
    b_t = b4.reshape(1, 4 * H_pad)
    return w_ih_t, w_hh_t, b_t


# --------------------------------------------------------------------------
# Encoder forward: embed -> per layer fused (projection + recurrence) kernel
# --------------------------------------------------------------------------
def lstm_encoder_forward(inputs, lengths, embed_table, layer_params,
                         *, time_block=None, batch_block=None):
    """LstmEncoder.forward: embed -> multi-layer LSTM (packed semantics)."""
    T, B = inputs.shape
    E = embed_table.shape[1]
    H = layer_params[0][1].shape[1]          # w_hh: [4H, H]

    B_pad = _round_up(max(B, 8), 8)
    E_pad = _round_up(E, 128)
    H_pad = _round_up(H, 128)   # small-H models pay a 128/H multiplier here

    # Batch block: do NOT split across TensorCores unless the batch is large
    # (small-B steps are latency-bound; splitting only duplicates w_hh in VMEM).
    if batch_block is None:
        Bt = B_pad if B_pad < 512 else _round_up(_ceil_div(B_pad, 2), 8)
    else:
        Bt = _round_up(min(max(batch_block, 1), B_pad), 8)
    while B_pad % Bt != 0:      # make Bt a divisor of B_pad (no dropped rows)
        Bt += 8

    # Generation-aware VMEM budgeting.
    cap = _vmem_capacity_bytes()
    vmem_limit = max(32 * 2**20, min(int(cap * 0.9), 110 * 2**20))
    budget = int(vmem_limit * 0.6)            # headroom for compiler scratch

    in_pad_max = max(E_pad, H_pad)
    if time_block is None:
        Tt = _choose_time_block(T, Bt, in_pad_max, H_pad, budget)
    else:
        Tt = max(1, min(int(time_block), T))
    T_pad = _round_up(T, Tt)    # pad time UP (masked steps are no-ops)

    # Embedder: plain JAX gather (glue).
    emb = embed_table[inputs]                                    # [T, B, E]
    x = jnp.pad(emb, ((0, T_pad - T), (0, B_pad - B), (0, E_pad - E)))
    len_pad = jnp.pad(lengths.astype(jnp.int32),
                      (0, B_pad - B)).reshape(B_pad, 1)

    hiddens, cells = [], []
    in_pad = E_pad
    for (w_ih, w_hh, b) in layer_params:
        w_ih_t, w_hh_t, b_t = _prep_lstm_weights(w_ih, w_hh, b, in_pad, H_pad)
        x, h_fin, c_fin = lstm_layer_pallas(x, w_ih_t, w_hh_t, b_t, len_pad,
                                            Tt, Bt, vmem_limit)
        hiddens.append(h_fin[:B, :H])
        cells.append(c_fin[:B, :H])
        in_pad = H_pad

    return {
        "memory_bank": x[:T, :B, :H],              # [T, B, H]
        "hidden": jnp.stack(hiddens, axis=0),      # [L, B, H]
        "cell": jnp.stack(cells, axis=0),          # [L, B, H]
    }


# --------------------------------------------------------------------------
# Pure-JAX reference (lax.scan) with identical packed-LSTM semantics
# --------------------------------------------------------------------------
def lstm_encoder_reference(inputs, lengths, embed_table, layer_params):
    x = embed_table[inputs]
    T, B, _ = x.shape
    hiddens, cells = [], []
    for (w_ih, w_hh, b) in layer_params:
        H = w_hh.shape[1]

        def step(carry, xt_t, w_ih=w_ih, w_hh=w_hh, b=b, H=H):
            h, c = carry
            xt, t = xt_t
            gates = xt @ w_ih.T + h @ w_hh.T + b
            i = jax.nn.sigmoid(gates[:, :H])
            f = jax.nn.sigmoid(gates[:, H:2 * H])
            g = jnp.tanh(gates[:, 2 * H:3 * H])
            o = jax.nn.sigmoid(gates[:, 3 * H:])
            c_new = f * c + i * g
            h_new = o * jnp.tanh(c_new)
            valid = (t < lengths)[:, None]
            h2 = jnp.where(valid, h_new, h)
            c2 = jnp.where(valid, c_new, c)
            out = jnp.where(valid, h_new, 0.0)
            return (h2, c2), out

        init = (jnp.zeros((B, H), jnp.float32), jnp.zeros((B, H), jnp.float32))
        (h_fin, c_fin), outs = jax.lax.scan(step, init, (x, jnp.arange(T)))
        hiddens.append(h_fin)
        cells.append(c_fin)
        x = outs
    return {"memory_bank": x,
            "hidden": jnp.stack(hiddens, 0),
            "cell": jnp.stack(cells, 0)}


def init_params(key, vocab_size, embed_dim, hidden_dim, num_layers):
    """Deterministic parameter init (PyTorch-style uniform(-1/sqrt(H), 1/sqrt(H)))."""
    keys = jax.random.split(key, 1 + 4 * num_layers)
    embed_table = jax.random.normal(keys[0], (vocab_size, embed_dim),
                                    jnp.float32) * 0.1
    k = 1.0 / jnp.sqrt(hidden_dim)
    layer_params = []
    for layer in range(num_layers):
        in_dim = embed_dim if layer == 0 else hidden_dim
        kw = keys[1 + 4 * layer:1 + 4 * (layer + 1)]
        w_ih = jax.random.uniform(kw[0], (4 * hidden_dim, in_dim),
                                  jnp.float32, -k, k)
        w_hh = jax.random.uniform(kw[1], (4 * hidden_dim, hidden_dim),
                                  jnp.float32, -k, k)
        b_ih = jax.random.uniform(kw[2], (1, 4 * hidden_dim),
                                  jnp.float32, -k, k)
        b_hh = jax.random.uniform(kw[3], (1, 4 * hidden_dim),
                                  jnp.float32, -k, k)
        layer_params.append((w_ih, w_hh, b_ih + b_hh))
    return embed_table, layer_params


if __name__ == "__main__":
    # Small deterministic example: seq=8, batch=2, embed=16, hidden=32, layers=2.
    T, B = 8, 2
    VOCAB, EMBED, HIDDEN, LAYERS = 20, 16, 32, 2

    key = jax.random.PRNGKey(0)
    k_tok, k_par = jax.random.split(key)
    inputs = jax.random.randint(k_tok, (T, B), 0, VOCAB, dtype=jnp.int32)
    lengths = jnp.array([8, 5], dtype=jnp.int32)

    embed_table, layer_params = init_params(k_par, VOCAB, EMBED, HIDDEN, LAYERS)

    out = lstm_encoder_forward(inputs, lengths, embed_table, layer_params)
    jax.block_until_ready(out)

    ref = lstm_encoder_reference(inputs, lengths, embed_table, layer_params)
    for name in ("memory_bank", "hidden", "cell"):
        assert out[name].shape == ref[name].shape, name
        # Fused/hoisted projection changes f32 summation order slightly.
        assert jnp.allclose(out[name], ref[name], atol=1e-4, rtol=1e-4), name

    print("KERNEL_OK")
</pallas_src>

<mosaic_0001>
module attributes {stable_mosaic.version = 11 : i64} {
  func.func @_lstm_layer_kernel(%arg0: i32, %arg1: i32, %arg2: memref<8x8x128xf32, #tpu.memory_space<vmem>>, %arg3: memref<128x512xf32, #tpu.memory_space<vmem>>, %arg4: memref<128x512xf32, #tpu.memory_space<vmem>>, %arg5: memref<1x512xf32, #tpu.memory_space<vmem>>, %arg6: memref<8x1xi32, #tpu.memory_space<vmem>>, %arg7: memref<8x8x128xf32, #tpu.memory_space<vmem>>, %arg8: memref<8x128xf32, #tpu.memory_space<vmem>>, %arg9: memref<8x128xf32, #tpu.memory_space<vmem>>, %arg10: memref<8x8x512xf32, #tpu.memory_space<vmem>>, %arg11: memref<8x128xf32, #tpu.memory_space<vmem>>, %arg12: memref<8x128xf32, #tpu.memory_space<vmem>>) attributes {dimension_semantics = [#tpu.dimension_semantics<parallel>, #tpu.dimension_semantics<arbitrary>], iteration_bounds = array<i64: 1, 1>, scalar_prefetch = 0 : i64, scratch_operands = 3 : i64, tpu.core_type = #tpu.core_type<tc>, window_params = [{transform_indices = @transform_0, window_bounds = array<i64: 8, 8, 128>}, {pipeline_mode = #tpu.pipeline_mode<synchronous>, transform_indices = @transform_1, window_bounds = array<i64: 128, 512>}, {pipeline_mode = #tpu.pipeline_mode<synchronous>, transform_indices = @transform_2, window_bounds = array<i64: 128, 512>}, {pipeline_mode = #tpu.pipeline_mode<synchronous>, transform_indices = @transform_3, window_bounds = array<i64: 1, 512>}, {transform_indices = @transform_4, window_bounds = array<i64: 8, 1>}, {transform_indices = @transform_5, window_bounds = array<i64: 8, 8, 128>}, {transform_indices = @transform_6, window_bounds = array<i64: 8, 128>}, {transform_indices = @transform_7, window_bounds = array<i64: 8, 128>}]} {
    %c0_i32 = arith.constant 0 : i32
    %0 = arith.cmpi eq, %arg1, %c0_i32 : i32
    %1 = arith.extui %0 : i1 to i32
    %c0_i32_0 = arith.constant 0 : i32
    %2 = arith.cmpi ne, %1, %c0_i32_0 : i32
    scf.if %2 {
      %cst_98 = arith.constant 0.000000e+00 : f32
      %398 = vector.broadcast %cst_98 : f32 to vector<8x128xf32>
      %c0_99 = arith.constant 0 : index
      %c0_100 = arith.constant 0 : index
      %399 = vector.load %arg11[%c0_99, %c0_100] : memref<8x128xf32, #tpu.memory_space<vmem>>, vector<8x128xf32>
      tpu.vector_store %arg11[%c0_99, %c0_100], %398 {strides = array<i32>} : memref<8x128xf32, #tpu.memory_space<vmem>>, vector<8x128xf32>,
      %cst_101 = arith.constant 0.000000e+00 : f32
      %400 = vector.broadcast %cst_101 : f32 to vector<8x128xf32>
      %c0_102 = arith.constant 0 : index
      %c0_103 = arith.constant 0 : index
      %401 = vector.load %arg12[%c0_102, %c0_103] : memref<8x128xf32, #tpu.memory_space<vmem>>, vector<8x128xf32>
      tpu.vector_store %arg12[%c0_102, %c0_103], %400 {strides = array<i32>} : memref<8x128xf32, #tpu.memory_space<vmem>>, vector<8x128xf32>,
    } else {
    }
    %c0 = arith.constant 0 : index
    %c0_1 = arith.constant 0 : index
    %c0_2 = arith.constant 0 : index
    %3 = vector.load %arg2[%c0, %c0_1, %c0_2] : memref<8x8x128xf32, #tpu.memory_space<vmem>>, vector<8x8x128xf32>
    %4 = vector.shape_cast %3 : vector<8x8x128xf32> to vector<64x128xf32>
    %c0_3 = arith.constant 0 : index
    %c0_4 = arith.constant 0 : index
    %5 = vector.load %arg3[%c0_3, %c0_4] : memref<128x512xf32, #tpu.memory_space<vmem>>, vector<128x512xf32>
    %cst = arith.constant dense<0.000000e+00> : vector<64x512xf32>
    %6 = tpu.matmul %4, %5, %cst {dimension_numbers = #tpu.dot_dimension_numbers<[1], [0], [0], [1], [0, 0, 1, 1], [], []>} : vector<64x128xf32>, vector<128x512xf32>, vector<64x512xf32> -> vector<64x512xf32>
    %c0_5 = arith.constant 0 : index
    %c0_6 = arith.constant 0 : index
    %7 = vector.load %arg5[%c0_5, %c0_6] : memref<1x512xf32, #tpu.memory_space<vmem>>, vector<1x512xf32>
    %8 = vector.broadcast %7 : vector<1x512xf32> to vector<64x512xf32>
    %9 = arith.addf %6, %8 : vector<64x512xf32>
    %10 = vector.shape_cast %9 : vector<64x512xf32> to vector<8x8x512xf32>
    %c0_7 = arith.constant 0 : index
    %c0_8 = arith.constant 0 : index
    %c0_9 = arith.constant 0 : index
    %11 = vector.load %arg10[%c0_7, %c0_8, %c0_9] : memref<8x8x512xf32, #tpu.memory_space<vmem>>, vector<8x8x512xf32>
    tpu.vector_store %arg10[%c0_7, %c0_8, %c0_9], %10 {strides = array<i32>} : memref<8x8x512xf32, #tpu.memory_space<vmem>>, vector<8x8x512xf32>,
    %c0_10 = arith.constant 0 : index
    %c0_11 = arith.constant 0 : index
    %12 = vector.load %arg4[%c0_10, %c0_11] : memref<128x512xf32, #tpu.memory_space<vmem>>, vector<128x512xf32>
    %c0_12 = arith.constant 0 : index
    %c0_13 = arith.constant 0 : index
    %13 = vector.load %arg6[%c0_12, %c0_13] : memref<8x1xi32, #tpu.memory_space<vmem>>, vector<8x1xi32>
    %c8_i32 = arith.constant 8 : i32
    %14 = arith.muli %arg1, %c8_i32 : i32
    %c0_14 = arith.constant 0 : index
    %c0_15 = arith.constant 0 : index
    %15 = vector.load %arg11[%c0_14, %c0_15] : memref<8x128xf32, #tpu.memory_space<vmem>>, vector<8x128xf32>
    %c0_16 = arith.constant 0 : index
    %c0_17 = arith.constant 0 : index
    %16 = vector.load %arg12[%c0_16, %c0_17] : memref<8x128xf32, #tpu.memory_space<vmem>>, vector<8x128xf32>
    %c0_i32_18 = arith.constant 0 : i32
    %17 = arith.index_cast %c0_i32_18 : i32 to index
    %c0_19 = arith.constant 0 : index
    %c0_20 = arith.constant 0 : index
    %18 = vector.load %arg10[%17, %c0_19, %c0_20] : memref<8x8x512xf32, #tpu.memory_space<vmem>>, vector<1x8x512xf32>
    %19 = vector.shape_cast %18 : vector<1x8x512xf32> to vector<8x512xf32>
    %cst_21 = arith.constant dense<0.000000e+00> : vector<8x512xf32>
    %20 = tpu.matmul %15, %12, %cst_21 {dimension_numbers = #tpu.dot_dimension_numbers<[1], [0], [0], [1], [0, 0, 1, 1], [], []>} : vector<8x128xf32>, vector<128x512xf32>, vector<8x512xf32> -> vector<8x512xf32>
    %21 = arith.addf %19, %20 : vector<8x512xf32>
    %22 = vector.extract_strided_slice %21 {offsets = [0, 0], sizes = [8, 128], strides = [1, 1]} : vector<8x512xf32> to vector<8x128xf32>
    %23 = arith.negf %22 : vector<8x128xf32>
    %24 = math.exp %23 : vector<8x128xf32>
    %cst_22 = arith.constant 1.000000e+00 : f32
    %25 = vector.broadcast %cst_22 : f32 to vector<8x128xf32>
    %26 = arith.addf %25, %24 : vector<8x128xf32>
    %27 = arith.divf %25, %26 : vector<8x128xf32>
    %28 = vector.extract_strided_slice %21 {offsets = [0, 128], sizes = [8, 128], strides = [1, 1]} : vector<8x512xf32> to vector<8x128xf32>
    %29 = arith.negf %28 : vector<8x128xf32>
    %30 = math.exp %29 : vector<8x128xf32>
    %cst_23 = arith.constant 1.000000e+00 : f32
    %31 = vector.broadcast %cst_23 : f32 to vector<8x128xf32>
    %32 = arith.addf %31, %30 : vector<8x128xf32>
    %33 = arith.divf %31, %32 : vector<8x128xf32>
    %34 = vector.extract_strided_slice %21 {offsets = [0, 256], sizes = [8, 128], strides = [1, 1]} : vector<8x512xf32> to vector<8x128xf32>
    %35 = math.tanh %34 : vector<8x128xf32>
    %36 = vector.extract_strided_slice %21 {offsets = [0, 384], sizes = [8, 128], strides = [1, 1]} : vector<8x512xf32> to vector<8x128xf32>
    %37 = arith.negf %36 : vector<8x128xf32>
    %38 = math.exp %37 : vector<8x128xf32>
    %cst_24 = arith.constant 1.000000e+00 : f32
    %39 = vector.broadcast %cst_24 : f32 to vector<8x128xf32>
    %40 = arith.addf %39, %38 : vector<8x128xf32>
    %41 = arith.divf %39, %40 : vector<8x128xf32>
    %42 = arith.mulf %33, %16 : vector<8x128xf32>
    %43 = arith.mulf %27, %35 : vector<8x128xf32>
    %44 = arith.addf %42, %43 : vector<8x128xf32>
    %45 = math.tanh %44 : vector<8x128xf32>
    %46 = arith.mulf %41, %45 : vector<8x128xf32>
    %47 = arith.addi %14, %c0_i32_18 : i32
    %48 = vector.broadcast %47 : i32 to vector<8x1xi32>
    %49 = arith.cmpi slt, %48, %13 : vector<8x1xi32>
    %cst_25 = arith.constant 0.000000e+00 : f32
    %50 = vector.shape_cast %49 : vector<8x1xi1> to vector<8x1xi1>
    %51 = vector.broadcast %50 : vector<8x1xi1> to vector<8x128xi1>
    %52 = vector.broadcast %cst_25 : f32 to vector<8x128xf32>
    %53 = arith.select %51, %46, %52 : vector<8x128xi1>, vector<8x128xf32>
    %54 = arith.index_cast %c0_i32_18 : i32 to index
    %c0_26 = arith.constant 0 : index
    %c0_27 = arith.constant 0 : index
    %55 = vector.load %arg7[%54, %c0_26, %c0_27] : memref<8x8x128xf32, #tpu.memory_space<vmem>>, vector<1x8x128xf32>
    %56 = vector.shape_cast %55 : vector<1x8x128xf32> to vector<8x128xf32>
    %57 = vector.shape_cast %53 : vector<8x128xf32> to vector<1x8x128xf32>
    tpu.vector_store %arg7[%54, %c0_26, %c0_27], %57 {strides = array<i32>} : memref<8x8x128xf32, #tpu.memory_space<vmem>>, vector<1x8x128xf32>,
    %58 = vector.shape_cast %49 : vector<8x1xi1> to vector<8x1xi1>
    %59 = vector.broadcast %58 : vector<8x1xi1> to vector<8x128xi1>
    %60 = arith.select %59, %46, %15 : vector<8x128xi1>, vector<8x128xf32>
    %61 = vector.shape_cast %49 : vector<8x1xi1> to vector<8x1xi1>
    %62 = vector.broadcast %61 : vector<8x1xi1> to vector<8x128xi1>
    %63 = arith.select %62, %44, %16 : vector<8x128xi1>, vector<8x128xf32>
    %c1_i32 = arith.constant 1 : i32
    %64 = arith.index_cast %c1_i32 : i32 to index
    %c0_28 = arith.constant 0 : index
    %c0_29 = arith.constant 0 : index
    %65 = vector.load %arg10[%64, %c0_28, %c0_29] : memref<8x8x512xf32, #tpu.memory_space<vmem>>, vector<1x8x512xf32>
    %66 = vector.shape_cast %65 : vector<1x8x512xf32> to vector<8x512xf32>
    %cst_30 = arith.constant dense<0.000000e+00> : vector<8x512xf32>
    %67 = tpu.matmul %60, %12, %cst_30 {dimension_numbers = #tpu.dot_dimension_numbers<[1], [0], [0], [1], [0, 0, 1, 1], [], []>} : vector<8x128xf32>, vector<128x512xf32>, vector<8x512xf32> -> vector<8x512xf32>
    %68 = arith.addf %66, %67 : vector<8x512xf32>
    %69 = vector.extract_strided_slice %68 {offsets = [0, 0], sizes = [8, 128], strides = [1, 1]} : vector<8x512xf32> to vector<8x128xf32>
    %70 = arith.negf %69 : vector<8x128xf32>
    %71 = math.exp %70 : vector<8x128xf32>
    %cst_31 = arith.constant 1.000000e+00 : f32
    %72 = vector.broadcast %cst_31 : f32 to vector<8x128xf32>
    %73 = arith.addf %72, %71 : vector<8x128xf32>
    %74 = arith.divf %72, %73 : vector<8x128xf32>
    %75 = vector.extract_strided_slice %68 {offsets = [0, 128], sizes = [8, 128], strides = [1, 1]} : vector<8x512xf32> to vector<8x128xf32>
    %76 = arith.negf %75 : vector<8x128xf32>
    %77 = math.exp %76 : vector<8x128xf32>
    %cst_32 = arith.constant 1.000000e+00 : f32
    %78 = vector.broadcast %cst_32 : f32 to vector<8x128xf32>
    %79 = arith.addf %78, %77 : vector<8x128xf32>
    %80 = arith.divf %78, %79 : vector<8x128xf32>
    %81 = vector.extract_strided_slice %68 {offsets = [0, 256], sizes = [8, 128], strides = [1, 1]} : vector<8x512xf32> to vector<8x128xf32>
    %82 = math.tanh %81 : vector<8x128xf32>
    %83 = vector.extract_strided_slice %68 {offsets = [0, 384], sizes = [8, 128], strides = [1, 1]} : vector<8x512xf32> to vector<8x128xf32>
    %84 = arith.negf %83 : vector<8x128xf32>
    %85 = math.exp %84 : vector<8x128xf32>
    %cst_33 = arith.constant 1.000000e+00 : f32
    %86 = vector.broadcast %cst_33 : f32 to vector<8x128xf32>
    %87 = arith.addf %86, %85 : vector<8x128xf32>
    %88 = arith.divf %86, %87 : vector<8x128xf32>
    %89 = arith.mulf %80, %63 : vector<8x128xf32>
    %90 = arith.mulf %74, %82 : vector<8x128xf32>
    %91 = arith.addf %89, %90 : vector<8x128xf32>
    %92 = math.tanh %91 : vector<8x128xf32>
    %93 = arith.mulf %88, %92 : vector<8x128xf32>
    %94 = arith.addi %14, %c1_i32 : i32
    %95 = vector.broadcast %94 : i32 to vector<8x1xi32>
    %96 = arith.cmpi slt, %95, %13 : vector<8x1xi32>
    %cst_34 = arith.constant 0.000000e+00 : f32
    %97 = vector.shape_cast %96 : vector<8x1xi1> to vector<8x1xi1>
    %98 = vector.broadcast %97 : vector<8x1xi1> to vector<8x128xi1>
    %99 = vector.broadcast %cst_34 : f32 to vector<8x128xf32>
    %100 = arith.select %98, %93, %99 : vector<8x128xi1>, vector<8x128xf32>
    %101 = arith.index_cast %c1_i32 : i32 to index
    %c0_35 = arith.constant 0 : index
    %c0_36 = arith.constant 0 : index
    %102 = vector.load %arg7[%101, %c0_35, %c0_36] : memref<8x8x128xf32, #tpu.memory_space<vmem>>, vector<1x8x128xf32>
    %103 = vector.shape_cast %102 : vector<1x8x128xf32> to vector<8x128xf32>
    %104 = vector.shape_cast %100 : vector<8x128xf32> to vector<1x8x128xf32>
    tpu.vector_store %arg7[%101, %c0_35, %c0_36], %104 {strides = array<i32>} : memref<8x8x128xf32, #tpu.memory_space<vmem>>, vector<1x8x128xf32>,
    %105 = vector.shape_cast %96 : vector<8x1xi1> to vector<8x1xi1>
    %106 = vector.broadcast %105 : vector<8x1xi1> to vector<8x128xi1>
    %107 = arith.select %106, %93, %60 : vector<8x128xi1>, vector<8x128xf32>
    %108 = vector.shape_cast %96 : vector<8x1xi1> to vector<8x1xi1>
    %109 = vector.broadcast %108 : vector<8x1xi1> to vector<8x128xi1>
    %110 = arith.select %109, %91, %63 : vector<8x128xi1>, vector<8x128xf32>
    %c2_i32 = arith.constant 2 : i32
    %111 = arith.index_cast %c2_i32 : i32 to index
    %c0_37 = arith.constant 0 : index
    %c0_38 = arith.constant 0 : index
    %112 = vector.load %arg10[%111, %c0_37, %c0_38] : memref<8x8x512xf32, #tpu.memory_space<vmem>>, vector<1x8x512xf32>
    %113 = vector.shape_cast %112 : vector<1x8x512xf32> to vector<8x512xf32>
    %cst_39 = arith.constant dense<0.000000e+00> : vector<8x512xf32>
    %114 = tpu.matmul %107, %12, %cst_39 {dimension_numbers = #tpu.dot_dimension_numbers<[1], [0], [0], [1], [0, 0, 1, 1], [], []>} : vector<8x128xf32>, vector<128x512xf32>, vector<8x512xf32> -> vector<8x512xf32>
    %115 = arith.addf %113, %114 : vector<8x512xf32>
    %116 = vector.extract_strided_slice %115 {offsets = [0, 0], sizes = [8, 128], strides = [1, 1]} : vector<8x512xf32> to vector<8x128xf32>
    %117 = arith.negf %116 : vector<8x128xf32>
    %118 = math.exp %117 : vector<8x128xf32>
    %cst_40 = arith.constant 1.000000e+00 : f32
    %119 = vector.broadcast %cst_40 : f32 to vector<8x128xf32>
    %120 = arith.addf %119, %118 : vector<8x128xf32>
    %121 = arith.divf %119, %120 : vector<8x128xf32>
    %122 = vector.extract_strided_slice %115 {offsets = [0, 128], sizes = [8, 128], strides = [1, 1]} : vector<8x512xf32> to vector<8x128xf32>
    %123 = arith.negf %122 : vector<8x128xf32>
    %124 = math.exp %123 : vector<8x128xf32>
    %cst_41 = arith.constant 1.000000e+00 : f32
    %125 = vector.broadcast %cst_41 : f32 to vector<8x128xf32>
    %126 = arith.addf %125, %124 : vector<8x128xf32>
    %127 = arith.divf %125, %126 : vector<8x128xf32>
    %128 = vector.extract_strided_slice %115 {offsets = [0, 256], sizes = [8, 128], strides = [1, 1]} : vector<8x512xf32> to vector<8x128xf32>
    %129 = math.tanh %128 : vector<8x128xf32>
    %130 = vector.extract_strided_slice %115 {offsets = [0, 384], sizes = [8, 128], strides = [1, 1]} : vector<8x512xf32> to vector<8x128xf32>
    %131 = arith.negf %130 : vector<8x128xf32>
    %132 = math.exp %131 : vector<8x128xf32>
    %cst_42 = arith.constant 1.000000e+00 : f32
    %133 = vector.broadcast %cst_42 : f32 to vector<8x128xf32>
    %134 = arith.addf %133, %132 : vector<8x128xf32>
    %135 = arith.divf %133, %134 : vector<8x128xf32>
    %136 = arith.mulf %127, %110 : vector<8x128xf32>
    %137 = arith.mulf %121, %129 : vector<8x128xf32>
    %138 = arith.addf %136, %137 : vector<8x128xf32>
    %139 = math.tanh %138 : vector<8x128xf32>
    %140 = arith.mulf %135, %139 : vector<8x128xf32>
    %141 = arith.addi %14, %c2_i32 : i32
    %142 = vector.broadcast %141 : i32 to vector<8x1xi32>
    %143 = arith.cmpi slt, %142, %13 : vector<8x1xi32>
    %cst_43 = arith.constant 0.000000e+00 : f32
    %144 = vector.shape_cast %143 : vector<8x1xi1> to vector<8x1xi1>
    %145 = vector.broadcast %144 : vector<8x1xi1> to vector<8x128xi1>
    %146 = vector.broadcast %cst_43 : f32 to vector<8x128xf32>
    %147 = arith.select %145, %140, %146 : vector<8x128xi1>, vector<8x128xf32>
    %148 = arith.index_cast %c2_i32 : i32 to index
    %c0_44 = arith.constant 0 : index
    %c0_45 = arith.constant 0 : index
    %149 = vector.load %arg7[%148, %c0_44, %c0_45] : memref<8x8x128xf32, #tpu.memory_space<vmem>>, vector<1x8x128xf32>
    %150 = vector.shape_cast %149 : vector<1x8x128xf32> to vector<8x128xf32>
    %151 = vector.shape_cast %147 : vector<8x128xf32> to vector<1x8x128xf32>
    tpu.vector_store %arg7[%148, %c0_44, %c0_45], %151 {strides = array<i32>} : memref<8x8x128xf32, #tpu.memory_space<vmem>>, vector<1x8x128xf32>,
    %152 = vector.shape_cast %143 : vector<8x1xi1> to vector<8x1xi1>
    %153 = vector.broadcast %152 : vector<8x1xi1> to vector<8x128xi1>
    %154 = arith.select %153, %140, %107 : vector<8x128xi1>, vector<8x128xf32>
    %155 = vector.shape_cast %143 : vector<8x1xi1> to vector<8x1xi1>
    %156 = vector.broadcast %155 : vector<8x1xi1> to vector<8x128xi1>
    %157 = arith.select %156, %138, %110 : vector<8x128xi1>, vector<8x128xf32>
    %c3_i32 = arith.constant 3 : i32
    %158 = arith.index_cast %c3_i32 : i32 to index
    %c0_46 = arith.constant 0 : index
    %c0_47 = arith.constant 0 : index
    %159 = vector.load %arg10[%158, %c0_46, %c0_47] : memref<8x8x512xf32, #tpu.memory_space<vmem>>, vector<1x8x512xf32>
    %160 = vector.shape_cast %159 : vector<1x8x512xf32> to vector<8x512xf32>
    %cst_48 = arith.constant dense<0.000000e+00> : vector<8x512xf32>
    %161 = tpu.matmul %154, %12, %cst_48 {dimension_numbers = #tpu.dot_dimension_numbers<[1], [0], [0], [1], [0, 0, 1, 1], [], []>} : vector<8x128xf32>, vector<128x512xf32>, vector<8x512xf32> -> vector<8x512xf32>
    %162 = arith.addf %160, %161 : vector<8x512xf32>
    %163 = vector.extract_strided_slice %162 {offsets = [0, 0], sizes = [8, 128], strides = [1, 1]} : vector<8x512xf32> to vector<8x128xf32>
    %164 = arith.negf %163 : vector<8x128xf32>
    %165 = math.exp %164 : vector<8x128xf32>
    %cst_49 = arith.constant 1.000000e+00 : f32
    %166 = vector.broadcast %cst_49 : f32 to vector<8x128xf32>
    %167 = arith.addf %166, %165 : vector<8x128xf32>
    %168 = arith.divf %166, %167 : vector<8x128xf32>
    %169 = vector.extract_strided_slice %162 {offsets = [0, 128], sizes = [8, 128], strides = [1, 1]} : vector<8x512xf32> to vector<8x128xf32>
    %170 = arith.negf %169 : vector<8x128xf32>
    %171 = math.exp %170 : vector<8x128xf32>
    %cst_50 = arith.constant 1.000000e+00 : f32
    %172 = vector.broadcast %cst_50 : f32 to vector<8x128xf32>
    %173 = arith.addf %172, %171 : vector<8x128xf32>
    %174 = arith.divf %172, %173 : vector<8x128xf32>
    %175 = vector.extract_strided_slice %162 {offsets = [0, 256], sizes = [8, 128], strides = [1, 1]} : vector<8x512xf32> to vector<8x128xf32>
    %176 = math.tanh %175 : vector<8x128xf32>
    %177 = vector.extract_strided_slice %162 {offsets = [0, 384], sizes = [8, 128], strides = [1, 1]} : vector<8x512xf32> to vector<8x128xf32>
    %178 = arith.negf %177 : vector<8x128xf32>
    %179 = math.exp %178 : vector<8x128xf32>
    %cst_51 = arith.constant 1.000000e+00 : f32
    %180 = vector.broadcast %cst_51 : f32 to vector<8x128xf32>
    %181 = arith.addf %180, %179 : vector<8x128xf32>
    %182 = arith.divf %180, %181 : vector<8x128xf32>
    %183 = arith.mulf %174, %157 : vector<8x128xf32>
    %184 = arith.mulf %168, %176 : vector<8x128xf32>
    %185 = arith.addf %183, %184 : vector<8x128xf32>
    %186 = math.tanh %185 : vector<8x128xf32>
    %187 = arith.mulf %182, %186 : vector<8x128xf32>
    %188 = arith.addi %14, %c3_i32 : i32
    %189 = vector.broadcast %188 : i32 to vector<8x1xi32>
    %190 = arith.cmpi slt, %189, %13 : vector<8x1xi32>
    %cst_52 = arith.constant 0.000000e+00 : f32
    %191 = vector.shape_cast %190 : vector<8x1xi1> to vector<8x1xi1>
    %192 = vector.broadcast %191 : vector<8x1xi1> to vector<8x128xi1>
    %193 = vector.broadcast %cst_52 : f32 to vector<8x128xf32>
    %194 = arith.select %192, %187, %193 : vector<8x128xi1>, vector<8x128xf32>
    %195 = arith.index_cast %c3_i32 : i32 to index
    %c0_53 = arith.constant 0 : index
    %c0_54 = arith.constant 0 : index
    %196 = vector.load %arg7[%195, %c0_53, %c0_54] : memref<8x8x128xf32, #tpu.memory_space<vmem>>, vector<1x8x128xf32>
    %197 = vector.shape_cast %196 : vector<1x8x128xf32> to vector<8x128xf32>
    %198 = vector.shape_cast %194 : vector<8x128xf32> to vector<1x8x128xf32>
    tpu.vector_store %arg7[%195, %c0_53, %c0_54], %198 {strides = array<i32>} : memref<8x8x128xf32, #tpu.memory_space<vmem>>, vector<1x8x128xf32>,
    %199 = vector.shape_cast %190 : vector<8x1xi1> to vector<8x1xi1>
    %200 = vector.broadcast %199 : vector<8x1xi1> to vector<8x128xi1>
    %201 = arith.select %200, %187, %154 : vector<8x128xi1>, vector<8x128xf32>
    %202 = vector.shape_cast %190 : vector<8x1xi1> to vector<8x1xi1>
    %203 = vector.broadcast %202 : vector<8x1xi1> to vector<8x128xi1>
    %204 = arith.select %203, %185, %157 : vector<8x128xi1>, vector<8x128xf32>
    %c4_i32 = arith.constant 4 : i32
    %205 = arith.index_cast %c4_i32 : i32 to index
    %c0_55 = arith.constant 0 : index
    %c0_56 = arith.constant 0 : index
    %206 = vector.load %arg10[%205, %c0_55, %c0_56] : memref<8x8x512xf32, #tpu.memory_space<vmem>>, vector<1x8x512xf32>
    %207 = vector.shape_cast %206 : vector<1x8x512xf32> to vector<8x512xf32>
    %cst_57 = arith.constant dense<0.000000e+00> : vector<8x512xf32>
    %208 = tpu.matmul %201, %12, %cst_57 {dimension_numbers = #tpu.dot_dimension_numbers<[1], [0], [0], [1], [0, 0, 1, 1], [], []>} : vector<8x128xf32>, vector<128x512xf32>, vector<8x512xf32> -> vector<8x512xf32>
    %209 = arith.addf %207, %208 : vector<8x512xf32>
    %210 = vector.extract_strided_slice %209 {offsets = [0, 0], sizes = [8, 128], strides = [1, 1]} : vector<8x512xf32> to vector<8x128xf32>
    %211 = arith.negf %210 : vector<8x128xf32>
    %212 = math.exp %211 : vector<8x128xf32>
    %cst_58 = arith.constant 1.000000e+00 : f32
    %213 = vector.broadcast %cst_58 : f32 to vector<8x128xf32>
    %214 = arith.addf %213, %212 : vector<8x128xf32>
    %215 = arith.divf %213, %214 : vector<8x128xf32>
    %216 = vector.extract_strided_slice %209 {offsets = [0, 128], sizes = [8, 128], strides = [1, 1]} : vector<8x512xf32> to vector<8x128xf32>
    %217 = arith.negf %216 : vector<8x128xf32>
    %218 = math.exp %217 : vector<8x128xf32>
    %cst_59 = arith.constant 1.000000e+00 : f32
    %219 = vector.broadcast %cst_59 : f32 to vector<8x128xf32>
    %220 = arith.addf %219, %218 : vector<8x128xf32>
    %221 = arith.divf %219, %220 : vector<8x128xf32>
    %222 = vector.extract_strided_slice %209 {offsets = [0, 256], sizes = [8, 128], strides = [1, 1]} : vector<8x512xf32> to vector<8x128xf32>
    %223 = math.tanh %222 : vector<8x128xf32>
    %224 = vector.extract_strided_slice %209 {offsets = [0, 384], sizes = [8, 128], strides = [1, 1]} : vector<8x512xf32> to vector<8x128xf32>
    %225 = arith.negf %224 : vector<8x128xf32>
    %226 = math.exp %225 : vector<8x128xf32>
    %cst_60 = arith.constant 1.000000e+00 : f32
    %227 = vector.broadcast %cst_60 : f32 to vector<8x128xf32>
    %228 = arith.addf %227, %226 : vector<8x128xf32>
    %229 = arith.divf %227, %228 : vector<8x128xf32>
    %230 = arith.mulf %221, %204 : vector<8x128xf32>
    %231 = arith.mulf %215, %223 : vector<8x128xf32>
    %232 = arith.addf %230, %231 : vector<8x128xf32>
    %233 = math.tanh %232 : vector<8x128xf32>
    %234 = arith.mulf %229, %233 : vector<8x128xf32>
    %235 = arith.addi %14, %c4_i32 : i32
    %236 = vector.broadcast %235 : i32 to vector<8x1xi32>
    %237 = arith.cmpi slt, %236, %13 : vector<8x1xi32>
    %cst_61 = arith.constant 0.000000e+00 : f32
    %238 = vector.shape_cast %237 : vector<8x1xi1> to vector<8x1xi1>
    %239 = vector.broadcast %238 : vector<8x1xi1> to vector<8x128xi1>
    %240 = vector.broadcast %cst_61 : f32 to vector<8x128xf32>
    %241 = arith.select %239, %234, %240 : vector<8x128xi1>, vector<8x128xf32>
    %242 = arith.index_cast %c4_i32 : i32 to index
    %c0_62 = arith.constant 0 : index
    %c0_63 = arith.constant 0 : index
    %243 = vector.load %arg7[%242, %c0_62, %c0_63] : memref<8x8x128xf32, #tpu.memory_space<vmem>>, vector<1x8x128xf32>
    %244 = vector.shape_cast %243 : vector<1x8x128xf32> to vector<8x128xf32>
    %245 = vector.shape_cast %241 : vector<8x128xf32> to vector<1x8x128xf32>
    tpu.vector_store %arg7[%242, %c0_62, %c0_63], %245 {strides = array<i32>} : memref<8x8x128xf32, #tpu.memory_space<vmem>>, vector<1x8x128xf32>,
    %246 = vector.shape_cast %237 : vector<8x1xi1> to vector<8x1xi1>
    %247 = vector.broadcast %246 : vector<8x1xi1> to vector<8x128xi1>
    %248 = arith.select %247, %234, %201 : vector<8x128xi1>, vector<8x128xf32>
    %249 = vector.shape_cast %237 : vector<8x1xi1> to vector<8x1xi1>
    %250 = vector.broadcast %249 : vector<8x1xi1> to vector<8x128xi1>
    %251 = arith.select %250, %232, %204 : vector<8x128xi1>, vector<8x128xf32>
    %c5_i32 = arith.constant 5 : i32
    %252 = arith.index_cast %c5_i32 : i32 to index
    %c0_64 = arith.constant 0 : index
    %c0_65 = arith.constant 0 : index
    %253 = vector.load %arg10[%252, %c0_64, %c0_65] : memref<8x8x512xf32, #tpu.memory_space<vmem>>, vector<1x8x512xf32>
    %254 = vector.shape_cast %253 : vector<1x8x512xf32> to vector<8x512xf32>
    %cst_66 = arith.constant dense<0.000000e+00> : vector<8x512xf32>
    %255 = tpu.matmul %248, %12, %cst_66 {dimension_numbers = #tpu.dot_dimension_numbers<[1], [0], [0], [1], [0, 0, 1, 1], [], []>} : vector<8x128xf32>, vector<128x512xf32>, vector<8x512xf32> -> vector<8x512xf32>
    %256 = arith.addf %254, %255 : vector<8x512xf32>
    %257 = vector.extract_strided_slice %256 {offsets = [0, 0], sizes = [8, 128], strides = [1, 1]} : vector<8x512xf32> to vector<8x128xf32>
    %258 = arith.negf %257 : vector<8x128xf32>
    %259 = math.exp %258 : vector<8x128xf32>
    %cst_67 = arith.constant 1.000000e+00 : f32
    %260 = vector.broadcast %cst_67 : f32 to vector<8x128xf32>
    %261 = arith.addf %260, %259 : vector<8x128xf32>
    %262 = arith.divf %260, %261 : vector<8x128xf32>
    %263 = vector.extract_strided_slice %256 {offsets = [0, 128], sizes = [8, 128], strides = [1, 1]} : vector<8x512xf32> to vector<8x128xf32>
    %264 = arith.negf %263 : vector<8x128xf32>
    %265 = math.exp %264 : vector<8x128xf32>
    %cst_68 = arith.constant 1.000000e+00 : f32
    %266 = vector.broadcast %cst_68 : f32 to vector<8x128xf32>
    %267 = arith.addf %266, %265 : vector<8x128xf32>
    %268 = arith.divf %266, %267 : vector<8x128xf32>
    %269 = vector.extract_strided_slice %256 {offsets = [0, 256], sizes = [8, 128], strides = [1, 1]} : vector<8x512xf32> to vector<8x128xf32>
    %270 = math.tanh %269 : vector<8x128xf32>
    %271 = vector.extract_strided_slice %256 {offsets = [0, 384], sizes = [8, 128], strides = [1, 1]} : vector<8x512xf32> to vector<8x128xf32>
    %272 = arith.negf %271 : vector<8x128xf32>
    %273 = math.exp %272 : vector<8x128xf32>
    %cst_69 = arith.constant 1.000000e+00 : f32
    %274 = vector.broadcast %cst_69 : f32 to vector<8x128xf32>
    %275 = arith.addf %274, %273 : vector<8x128xf32>
    %276 = arith.divf %274, %275 : vector<8x128xf32>
    %277 = arith.mulf %268, %251 : vector<8x128xf32>
    %278 = arith.mulf %262, %270 : vector<8x128xf32>
    %279 = arith.addf %277, %278 : vector<8x128xf32>
    %280 = math.tanh %279 : vector<8x128xf32>
    %281 = arith.mulf %276, %280 : vector<8x128xf32>
    %282 = arith.addi %14, %c5_i32 : i32
    %283 = vector.broadcast %282 : i32 to vector<8x1xi32>
    %284 = arith.cmpi slt, %283, %13 : vector<8x1xi32>
    %cst_70 = arith.constant 0.000000e+00 : f32
    %285 = vector.shape_cast %284 : vector<8x1xi1> to vector<8x1xi1>
    %286 = vector.broadcast %285 : vector<8x1xi1> to vector<8x128xi1>
    %287 = vector.broadcast %cst_70 : f32 to vector<8x128xf32>
    %288 = arith.select %286, %281, %287 : vector<8x128xi1>, vector<8x128xf32>
    %289 = arith.index_cast %c5_i32 : i32 to index
    %c0_71 = arith.constant 0 : index
    %c0_72 = arith.constant 0 : index
    %290 = vector.load %arg7[%289, %c0_71, %c0_72] : memref<8x8x128xf32, #tpu.memory_space<vmem>>, vector<1x8x128xf32>
    %291 = vector.shape_cast %290 : vector<1x8x128xf32> to vector<8x128xf32>
    %292 = vector.shape_cast %288 : vector<8x128xf32> to vector<1x8x128xf32>
    tpu.vector_store %arg7[%289, %c0_71, %c0_72], %292 {strides = array<i32>} : memref<8x8x128xf32, #tpu.memory_space<vmem>>, vector<1x8x128xf32>,
    %293 = vector.shape_cast %284 : vector<8x1xi1> to vector<8x1xi1>
    %294 = vector.broadcast %293 : vector<8x1xi1> to vector<8x128xi1>
    %295 = arith.select %294, %281, %248 : vector<8x128xi1>, vector<8x128xf32>
    %296 = vector.shape_cast %284 : vector<8x1xi1> to vector<8x1xi1>
    %297 = vector.broadcast %296 : vector<8x1xi1> to vector<8x128xi1>
    %298 = arith.select %297, %279, %251 : vector<8x128xi1>, vector<8x128xf32>
    %c6_i32 = arith.constant 6 : i32
    %299 = arith.index_cast %c6_i32 : i32 to index
    %c0_73 = arith.constant 0 : index
    %c0_74 = arith.constant 0 : index
    %300 = vector.load %arg10[%299, %c0_73, %c0_74] : memref<8x8x512xf32, #tpu.memory_space<vmem>>, vector<1x8x512xf32>
    %301 = vector.shape_cast %300 : vector<1x8x512xf32> to vector<8x512xf32>
    %cst_75 = arith.constant dense<0.000000e+00> : vector<8x512xf32>
    %302 = tpu.matmul %295, %12, %cst_75 {dimension_numbers = #tpu.dot_dimension_numbers<[1], [0], [0], [1], [0, 0, 1, 1], [], []>} : vector<8x128xf32>, vector<128x512xf32>, vector<8x512xf32> -> vector<8x512xf32>
    %303 = arith.addf %301, %302 : vector<8x512xf32>
    %304 = vector.extract_strided_slice %303 {offsets = [0, 0], sizes = [8, 128], strides = [1, 1]} : vector<8x512xf32> to vector<8x128xf32>
    %305 = arith.negf %304 : vector<8x128xf32>
    %306 = math.exp %305 : vector<8x128xf32>
    %cst_76 = arith.constant 1.000000e+00 : f32
    %307 = vector.broadcast %cst_76 : f32 to vector<8x128xf32>
    %308 = arith.addf %307, %306 : vector<8x128xf32>
    %309 = arith.divf %307, %308 : vector<8x128xf32>
    %310 = vector.extract_strided_slice %303 {offsets = [0, 128], sizes = [8, 128], strides = [1, 1]} : vector<8x512xf32> to vector<8x128xf32>
    %311 = arith.negf %310 : vector<8x128xf32>
    %312 = math.exp %311 : vector<8x128xf32>
    %cst_77 = arith.constant 1.000000e+00 : f32
    %313 = vector.broadcast %cst_77 : f32 to vector<8x128xf32>
    %314 = arith.addf %313, %312 : vector<8x128xf32>
    %315 = arith.divf %313, %314 : vector<8x128xf32>
    %316 = vector.extract_strided_slice %303 {offsets = [0, 256], sizes = [8, 128], strides = [1, 1]} : vector<8x512xf32> to vector<8x128xf32>
    %317 = math.tanh %316 : vector<8x128xf32>
    %318 = vector.extract_strided_slice %303 {offsets = [0, 384], sizes = [8, 128], strides = [1, 1]} : vector<8x512xf32> to vector<8x128xf32>
    %319 = arith.negf %318 : vector<8x128xf32>
    %320 = math.exp %319 : vector<8x128xf32>
    %cst_78 = arith.constant 1.000000e+00 : f32
    %321 = vector.broadcast %cst_78 : f32 to vector<8x128xf32>
    %322 = arith.addf %321, %320 : vector<8x128xf32>
    %323 = arith.divf %321, %322 : vector<8x128xf32>
    %324 = arith.mulf %315, %298 : vector<8x128xf32>
    %325 = arith.mulf %309, %317 : vector<8x128xf32>
    %326 = arith.addf %324, %325 : vector<8x128xf32>
    %327 = math.tanh %326 : vector<8x128xf32>
    %328 = arith.mulf %323, %327 : vector<8x128xf32>
    %329 = arith.addi %14, %c6_i32 : i32
    %330 = vector.broadcast %329 : i32 to vector<8x1xi32>
    %331 = arith.cmpi slt, %330, %13 : vector<8x1xi32>
    %cst_79 = arith.constant 0.000000e+00 : f32
    %332 = vector.shape_cast %331 : vector<8x1xi1> to vector<8x1xi1>
    %333 = vector.broadcast %332 : vector<8x1xi1> to vector<8x128xi1>
    %334 = vector.broadcast %cst_79 : f32 to vector<8x128xf32>
    %335 = arith.select %333, %328, %334 : vector<8x128xi1>, vector<8x128xf32>
    %336 = arith.index_cast %c6_i32 : i32 to index
    %c0_80 = arith.constant 0 : index
    %c0_81 = arith.constant 0 : index
    %337 = vector.load %arg7[%336, %c0_80, %c0_81] : memref<8x8x128xf32, #tpu.memory_space<vmem>>, vector<1x8x128xf32>
    %338 = vector.shape_cast %337 : vector<1x8x128xf32> to vector<8x128xf32>
    %339 = vector.shape_cast %335 : vector<8x128xf32> to vector<1x8x128xf32>
    tpu.vector_store %arg7[%336, %c0_80, %c0_81], %339 {strides = array<i32>} : memref<8x8x128xf32, #tpu.memory_space<vmem>>, vector<1x8x128xf32>,
    %340 = vector.shape_cast %331 : vector<8x1xi1> to vector<8x1xi1>
    %341 = vector.broadcast %340 : vector<8x1xi1> to vector<8x128xi1>
    %342 = arith.select %341, %328, %295 : vector<8x128xi1>, vector<8x128xf32>
    %343 = vector.shape_cast %331 : vector<8x1xi1> to vector<8x1xi1>
    %344 = vector.broadcast %343 : vector<8x1xi1> to vector<8x128xi1>
    %345 = arith.select %344, %326, %298 : vector<8x128xi1>, vector<8x128xf32>
    %c7_i32 = arith.constant 7 : i32
    %346 = arith.index_cast %c7_i32 : i32 to index
    %c0_82 = arith.constant 0 : index
    %c0_83 = arith.constant 0 : index
    %347 = vector.load %arg10[%346, %c0_82, %c0_83] : memref<8x8x512xf32, #tpu.memory_space<vmem>>, vector<1x8x512xf32>
    %348 = vector.shape_cast %347 : vector<1x8x512xf32> to vector<8x512xf32>
    %cst_84 = arith.constant dense<0.000000e+00> : vector<8x512xf32>
    %349 = tpu.matmul %342, %12, %cst_84 {dimension_numbers = #tpu.dot_dimension_numbers<[1], [0], [0], [1], [0, 0, 1, 1], [], []>} : vector<8x128xf32>, vector<128x512xf32>, vector<8x512xf32> -> vector<8x512xf32>
    %350 = arith.addf %348, %349 : vector<8x512xf32>
    %351 = vector.extract_strided_slice %350 {offsets = [0, 0], sizes = [8, 128], strides = [1, 1]} : vector<8x512xf32> to vector<8x128xf32>
    %352 = arith.negf %351 : vector<8x128xf32>
    %353 = math.exp %352 : vector<8x128xf32>
    %cst_85 = arith.constant 1.000000e+00 : f32
    %354 = vector.broadcast %cst_85 : f32 to vector<8x128xf32>
    %355 = arith.addf %354, %353 : vector<8x128xf32>
    %356 = arith.divf %354, %355 : vector<8x128xf32>
    %357 = vector.extract_strided_slice %350 {offsets = [0, 128], sizes = [8, 128], strides = [1, 1]} : vector<8x512xf32> to vector<8x128xf32>
    %358 = arith.negf %357 : vector<8x128xf32>
    %359 = math.exp %358 : vector<8x128xf32>
    %cst_86 = arith.constant 1.000000e+00 : f32
    %360 = vector.broadcast %cst_86 : f32 to vector<8x128xf32>
    %361 = arith.addf %360, %359 : vector<8x128xf32>
    %362 = arith.divf %360, %361 : vector<8x128xf32>
    %363 = vector.extract_strided_slice %350 {offsets = [0, 256], sizes = [8, 128], strides = [1, 1]} : vector<8x512xf32> to vector<8x128xf32>
    %364 = math.tanh %363 : vector<8x128xf32>
    %365 = vector.extract_strided_slice %350 {offsets = [0, 384], sizes = [8, 128], strides = [1, 1]} : vector<8x512xf32> to vector<8x128xf32>
    %366 = arith.negf %365 : vector<8x128xf32>
    %367 = math.exp %366 : vector<8x128xf32>
    %cst_87 = arith.constant 1.000000e+00 : f32
    %368 = vector.broadcast %cst_87 : f32 to vector<8x128xf32>
    %369 = arith.addf %368, %367 : vector<8x128xf32>
    %370 = arith.divf %368, %369 : vector<8x128xf32>
    %371 = arith.mulf %362, %345 : vector<8x128xf32>
    %372 = arith.mulf %356, %364 : vector<8x128xf32>
    %373 = arith.addf %371, %372 : vector<8x128xf32>
    %374 = math.tanh %373 : vector<8x128xf32>
    %375 = arith.mulf %370, %374 : vector<8x128xf32>
    %376 = arith.addi %14, %c7_i32 : i32
    %377 = vector.broadcast %376 : i32 to vector<8x1xi32>
    %378 = arith.cmpi slt, %377, %13 : vector<8x1xi32>
    %cst_88 = arith.constant 0.000000e+00 : f32
    %379 = vector.shape_cast %378 : vector<8x1xi1> to vector<8x1xi1>
    %380 = vector.broadcast %379 : vector<8x1xi1> to vector<8x128xi1>
    %381 = vector.broadcast %cst_88 : f32 to vector<8x128xf32>
    %382 = arith.select %380, %375, %381 : vector<8x128xi1>, vector<8x128xf32>
    %383 = arith.index_cast %c7_i32 : i32 to index
    %c0_89 = arith.constant 0 : index
    %c0_90 = arith.constant 0 : index
    %384 = vector.load %arg7[%383, %c0_89, %c0_90] : memref<8x8x128xf32, #tpu.memory_space<vmem>>, vector<1x8x128xf32>
    %385 = vector.shape_cast %384 : vector<1x8x128xf32> to vector<8x128xf32>
    %386 = vector.shape_cast %382 : vector<8x128xf32> to vector<1x8x128xf32>
    tpu.vector_store %arg7[%383, %c0_89, %c0_90], %386 {strides = array<i32>} : memref<8x8x128xf32, #tpu.memory_space<vmem>>, vector<1x8x128xf32>,
    %387 = vector.shape_cast %378 : vector<8x1xi1> to vector<8x1xi1>
    %388 = vector.broadcast %387 : vector<8x1xi1> to vector<8x128xi1>
    %389 = arith.select %388, %375, %342 : vector<8x128xi1>, vector<8x128xf32>
    %390 = vector.shape_cast %378 : vector<8x1xi1> to vector<8x1xi1>
    %391 = vector.broadcast %390 : vector<8x1xi1> to vector<8x128xi1>
    %392 = arith.select %391, %373, %345 : vector<8x128xi1>, vector<8x128xf32>
    %c8_i32_91 = arith.constant 8 : i32
    %c0_92 = arith.constant 0 : index
    %c0_93 = arith.constant 0 : index
    %393 = vector.load %arg11[%c0_92, %c0_93] : memref<8x128xf32, #tpu.memory_space<vmem>>, vector<8x128xf32>
    tpu.vector_store %arg11[%c0_92, %c0_93], %389 {strides = array<i32>} : memref<8x128xf32, #tpu.memory_space<vmem>>, vector<8x128xf32>,
    %c0_94 = arith.constant 0 : index
    %c0_95 = arith.constant 0 : index
    %394 = vector.load %arg12[%c0_94, %c0_95] : memref<8x128xf32, #tpu.memory_space<vmem>>, vector<8x128xf32>
    tpu.vector_store %arg12[%c0_94, %c0_95], %392 {strides = array<i32>} : memref<8x128xf32, #tpu.memory_space<vmem>>, vector<8x128xf32>,
    %c0_i32_96 = arith.constant 0 : i32
    %395 = arith.cmpi eq, %arg1, %c0_i32_96 : i32
    %396 = arith.extui %395 : i1 to i32
    %c0_i32_97 = arith.constant 0 : i32
    %397 = arith.cmpi ne, %396, %c0_i32_97 : i32
    scf.if %397 {
      %c0_98 = arith.constant 0 : index
      %c0_99 = arith.constant 0 : index
      %398 = vector.load %arg8[%c0_98, %c0_99] : memref<8x128xf32, #tpu.memory_space<vmem>>, vector<8x128xf32>
      tpu.vector_store %arg8[%c0_98, %c0_99], %389 {strides = array<i32>} : memref<8x128xf32, #tpu.memory_space<vmem>>, vector<8x128xf32>,
      %c0_100 = arith.constant 0 : index
      %c0_101 = arith.constant 0 : index
      %399 = vector.load %arg9[%c0_100, %c0_101] : memref<8x128xf32, #tpu.memory_space<vmem>>, vector<8x128xf32>
      tpu.vector_store %arg9[%c0_100, %c0_101], %392 {strides = array<i32>} : memref<8x128xf32, #tpu.memory_space<vmem>>, vector<8x128xf32>,
    } else {
    }
    return
  }
  func.func @transform_0(%arg0: i32, %arg1: i32) -> (i32, i32, i32) {
    %c0_i32 = arith.constant 0 : i32
    %c0_i32_0 = arith.constant 0 : i32
    return %arg1, %arg0, %c0_i32 : i32, i32, i32
  }
  func.func @transform_1(%arg0: i32, %arg1: i32) -> (i32, i32) {
    %c0_i32 = arith.constant 0 : i32
    %c0_i32_0 = arith.constant 0 : i32
    %c0_i32_1 = arith.constant 0 : i32
    return %c0_i32, %c0_i32_0 : i32, i32
  }
  func.func @transform_2(%arg0: i32, %arg1: i32) -> (i32, i32) {
    %c0_i32 = arith.constant 0 : i32
    %c0_i32_0 = arith.constant 0 : i32
    %c0_i32_1 = arith.constant 0 : i32
    return %c0_i32, %c0_i32_0 : i32, i32
  }
  func.func @transform_3(%arg0: i32, %arg1: i32) -> (i32, i32) {
    %c0_i32 = arith.constant 0 : i32
    %c0_i32_0 = arith.constant 0 : i32
    %c0_i32_1 = arith.constant 0 : i32
    return %c0_i32, %c0_i32_0 : i32, i32
  }
  func.func @transform_4(%arg0: i32, %arg1: i32) -> (i32, i32) {
    %c0_i32 = arith.constant 0 : i32
    %c0_i32_0 = arith.constant 0 : i32
    return %arg0, %c0_i32 : i32, i32
  }
  func.func @transform_5(%arg0: i32, %arg1: i32) -> (i32, i32, i32) {
    %c0_i32 = arith.constant 0 : i32
    %c0_i32_0 = arith.constant 0 : i32
    return %arg1, %arg0, %c0_i32 : i32, i32, i32
  }
  func.func @transform_6(%arg0: i32, %arg1: i32) -> (i32, i32) {
    %c0_i32 = arith.constant 0 : i32
    %c0_i32_0 = arith.constant 0 : i32
    return %arg0, %c0_i32 : i32, i32
  }
  func.func @transform_7(%arg0: i32, %arg1: i32) -> (i32, i32) {
    %c0_i32 = arith.constant 0 : i32
    %c0_i32_0 = arith.constant 0 : i32
    return %arg0, %c0_i32 : i32, i32
  }
}

</mosaic_0001>

<bundles_post_ra>
// kernel: tpu_custom_call.1
= control target key start
LH: loop header
LB: loop body
LE: loop exit
PB: predicated region body
PF: predicated region fallthrough
CT: control target
= control target key end

     0   :  { %13 = vsyncpa [#allocation6], 0  ;;  %s3627_s0 = inlined_call_operand.hbm [shape: f32[8,8,128], index: 0, kind: input, shape index: {}]   ;;  %s3628_s1 = inlined_call_operand.hbm [shape: f32[128,512], index: 1, kind: input, shape index: {}]   ;;  %s3629_s2 = inlined_call_operand.hbm [shape: f32[128,512], index: 2, kind: input, shape index: {}]   ;;  %s3630_s3 = inlined_call_operand.vmem [shape: f32[1,512], index: 3, kind: input, shape index: {}]   ;;  %s3631_s4 = inlined_call_operand.vmem [shape: s32[8,1], index: 4, kind: input, shape index: {}]   ;;  %s3632_s5 = inlined_call_operand.hbm [shape: f32[8,8,128], index: 5, kind: output, shape index: {0}]   ;;  %s3633_s6 = inlined_call_operand.hbm [shape: f32[8,128], index: 6, kind: output, shape index: {1}]   ;;  %s3634_s7 = inlined_call_operand.hbm [shape: f32[8,128], index: 7, kind: output, shape index: {2}]  }
   0x1   :  { %14 = vsyncpa [#allocation9], 0 }
   0x2   :  { %15 = vsyncpa [#allocation7], 0 }
   0x3   :  { %16 = vsyncpa [#allocation13], 0  ;;  %s3001_s24 = smov [#allocation8]   ;;  %s2861_s28 = scalar_lea.hbm %s3628_s1, 8192 }
   0x4   :  { %s34_s25 = sshll.u32 %s3001_s24, 4  ;;  %p2862_p0 = scmp.ne.s32.totalorder %s3628_s1, %s2861_s28  ;;  %s35_s25 = int_to_ptr.vmem [resolvable:$true] %s34_s25 }
   0x5   :  { %p2865_p1 = scmp.lt.u32.totalorder %s2861_s28, %s3628_s1 }
   0x7   :  { %p2867_p2 = pnand %p2865_p1, %p2862_p0 }
   0x9   :  { %2870 = shalt.err (!%p2867_p2)
}
   0xa   :  { %s2871_s10 = scalar_lea.vmem %s35_s25, 8192  ;;  %p2876_p4 = scmp.lt.s32.totalorder %s35_s25, %s35_s25 }
   0xb   :  { %p2872_p3 = scmp.ne.s32.totalorder %s35_s25, %s2871_s10  ;;  %p2877_p5 = scmp.lt.s32.totalorder %s2871_s10, %s2871_s10 }
   0xd   :  { %p2878_p6 = por %p2877_p5, %p2876_p4 }
   0xf   :  { %p2879_p7 = pnand %p2878_p6, %p2872_p3 }
  0x11   :  { %2882 = shalt.err (!%p2879_p7)
}
  0x12   :  { %s3002_s11 = smov 512   ;;  %s3003_s12 = smov 32  }
  0x13   :  { %40 = dma.hbm_to_vmem [thread:$0]  %s3628_s1, 8192, %s35_s25, [#allocation9], %s3002_s11, %s3002_s11, %s3003_s12  }
  0x14   :  { %s3004_s15 = smov [#allocation5]   ;;  %s2883_s19 = scalar_lea.hbm %s3627_s0, 1024 }
  0x15   :  { %s22_s16 = sshll.u32 %s3004_s15, 4  ;;  %p2884_p8 = scmp.ne.s32.totalorder %s3627_s0, %s2883_s19  ;;  %s23_s16 = int_to_ptr.vmem [resolvable:$true] %s22_s16 }
  0x16   :  { %p2887_p9 = scmp.lt.u32.totalorder %s2883_s19, %s3627_s0 }
  0x18   :  { %p2889_p10 = pnand %p2887_p9, %p2884_p8 }
  0x1a   :  { %2892 = shalt.err (!%p2889_p10)
}
  0x1b   :  { %s2893_s24 = scalar_lea.vmem %s23_s16, 1024  ;;  %p2898_p12 = scmp.lt.s32.totalorder %s23_s16, %s23_s16 }
  0x1c   :  { %p2894_p11 = scmp.ne.s32.totalorder %s23_s16, %s2893_s24  ;;  %p2899_p13 = scmp.lt.s32.totalorder %s2893_s24, %s2893_s24 }
  0x1e   :  { %p2900_p0 = por %p2899_p13, %p2898_p12 }
  0x20   :  { %p2901_p1 = pnand %p2900_p0, %p2894_p11 }
  0x22   :  { %2904 = shalt.err (!%p2901_p1)
}
  0x23   :  { %s3005_s1 = smov 128   ;;  %s3006_s25 = smov 8  }
  0x24   :  { %28 = dma.hbm_to_vmem [thread:$0]  %s3627_s0, 1024, %s23_s16, [#allocation6], %s3005_s1, %s3005_s1, %s3006_s25  }
  0x25   :  { %s3007_s28 = smov [#allocation10]   ;;  %s2905_s9 = scalar_lea.hbm %s3629_s2, 8192 }
  0x26   :  { %s46_s29 = sshll.u32 %s3007_s28, 4  ;;  %p2906_p2 = scmp.ne.s32.totalorder %s3629_s2, %s2905_s9  ;;  %s47_s29 = int_to_ptr.vmem [resolvable:$true] %s46_s29 }
  0x27   :  { %p2909_p3 = scmp.lt.u32.totalorder %s2905_s9, %s3629_s2 }
  0x29   :  { %p2911_p4 = pnand %p2909_p3, %p2906_p2 }
  0x2b   :  { %2914 = shalt.err (!%p2911_p4)
}
  0x2c   :  { %s2915_s17 = scalar_lea.vmem %s47_s29, 8192  ;;  %p2920_p6 = scmp.lt.s32.totalorder %s47_s29, %s47_s29 }
  0x2d   :  { %p2916_p5 = scmp.ne.s32.totalorder %s47_s29, %s2915_s17  ;;  %p2921_p7 = scmp.lt.s32.totalorder %s2915_s17, %s2915_s17 }
  0x2f   :  { %p2922_p8 = por %p2921_p7, %p2920_p6 }
  0x31   :  { %p2923_p9 = pnand %p2922_p8, %p2916_p5 }
  0x33   :  { %2926 = shalt.err (!%p2923_p9)
}
  0x34   :  { %52 = dma.hbm_to_vmem [thread:$0]  %s3629_s2, 8192, %s47_s29, [#allocation9], %s3002_s11, %s3002_s11, %s3003_s12  }
  0x35   :  { %2993 = dma.done.wait [#allocation6], 1024  }
  0x36   :  { %2994 = vsyncadd [#allocation6], 4294966272 }
  0x37   :  { %2995 = dma.done.wait [#allocation9], 16384  }
  0x38   :  { %2996 = vsyncadd [#allocation9], 4294950912  ;;  %v3008_v0 = vmov 0.0   ;;  %v3009_v1 = vmov 0   ;;  %v81_v2 = vld [vmem:[#allocation8 + $0x8] sm:$0xff]  ;;  %v83_v4 = vld [vmem:[#allocation8 + $0x18] sm:$0xff] }
  0x39   :  { %230 = vmatprep.mubr.f32.mxu0 %v3008_v0  ;;  %343 = vmatprep.mubr.f32.mxu1 %v3008_v0  ;;  %v85_v3 = vld [vmem:[#allocation8 + $0x28] sm:$0xff]  ;;  %v87_v6 = vld [vmem:[#allocation8 + $0x38] sm:$0xff]  ;;  %v80_v7 = vld [vmem:[#allocation8] sm:$0xff]  ;;  %s3011_s19 = smov [#allocation11]   ;;  %s3012_s21 = smov [#allocation14]  }
  0x3a   :  { %2731 = vset.pattern.permute.xlu0 %v3009_v1  ;;  %2732 = vset.pattern.permute.xlu1 %v3009_v1  ;;  %v2079_v5 = vpack.c.bf16 %v85_v3, %v81_v2  ;;  %v84_v8 = vld [vmem:[#allocation8 + $0x20] sm:$0xff]  ;;  %v2111_v9 = vpack.c.bf16 %v87_v6, %v83_v4  ;;  %v82_v11 = vld [vmem:[#allocation8 + $0x10] sm:$0xff]  ;;  %v89_v13 = vld [vmem:[#allocation8 + $0x48] sm:$0xff]  ;;  %s2005_s20 = sshll.u32 %s3011_s19, 4  ;;  %s2028_s22 = sshll.u32 %s3012_s21, 4  ;;  %s3574_s20 = int_to_ptr.vmem [resolvable:$true] %s2005_s20  ;;  %s3576_s22 = int_to_ptr.vmem [resolvable:$true] %s2028_s22 }
  0x3b   :  { %v2081_v10 = vpack.c.bf16 %v84_v8, %v80_v7  ;;  %v86_v12 = vld [vmem:[#allocation8 + $0x30] sm:$0xff]  ;;  %v93_v15 = vld [vmem:[#allocation8 + $0x68] sm:$0xff]  ;;  %v91_v16 = vld [vmem:[#allocation8 + $0x58] sm:$0xff] }
  0x3c   :  { %2080 = vmatprep.subr.bf16.mxu0 %v2079_v5  ;;  %v2113_v14 = vpack.c.bf16 %v86_v12, %v82_v11  ;;  %v95_v17 = vld [vmem:[#allocation8 + $0x78] sm:$0xff]  ;;  %2112 = vmatprep.subr.bf16.mxu1 %v2111_v9  ;;  %v2083_v18 = vpack.c.bf16 %v93_v15, %v89_v13  ;;  %v88_v20 = vld [vmem:[#allocation8 + $0x40] sm:$0xff]  ;;  %v90_v22 = vld [vmem:[#allocation8 + $0x50] sm:$0xff] }
  0x3d   :  { %2082 = vmatpush1.bf16.msra.mxu0 %v2081_v10  ;;  %v2115_v19 = vpack.c.bf16 %v95_v17, %v91_v16  ;;  %v92_v21 = vld [vmem:[#allocation8 + $0x60] sm:$0xff]  ;;  %v94_v24 = vld [vmem:[#allocation8 + $0x70] sm:$0xff]  ;;  %v97_v25 = vld [vmem:[#allocation8 + $0x88] sm:$0xff] }
  0x3e   :  { %2114 = vmatpush1.bf16.msra.mxu1 %v2113_v14  ;;  %v2085_v23 = vpack.c.bf16 %v92_v21, %v88_v20  ;;  %v101_v26 = vld [vmem:[#allocation8 + $0xa8] sm:$0xff]  ;;  %2084 = vmatprep.subr.bf16.mxu0 %v2083_v18  ;;  %v2117_v27 = vpack.c.bf16 %v94_v24, %v90_v22  ;;  %v99_v29 = vld [vmem:[#allocation8 + $0x98] sm:$0xff]  ;;  %v96_v31 = vld [vmem:[#allocation8 + $0x80] sm:$0xff] }
  0x3f   :  { %2116 = vmatprep.subr.bf16.mxu1 %v2115_v19  ;;  %v2087_v28 = vpack.c.bf16 %v101_v26, %v97_v25  ;;  %v103_v30 = vld [vmem:[#allocation8 + $0xb8] sm:$0xff]  ;;  %v100_v33 = vld [vmem:[#allocation8 + $0xa0] sm:$0xff]  ;;  %v98_v34 = vld [vmem:[#allocation8 + $0x90] sm:$0xff] }
  0x40   :  { %v2119_v32 = vpack.c.bf16 %v103_v30, %v99_v29  ;;  %v102_v35 = vld [vmem:[#allocation8 + $0xb0] sm:$0xff]  ;;  %v2089_v36 = vpack.c.bf16 %v100_v33, %v96_v31  ;;  %v105_v37 = vld [vmem:[#allocation8 + $0xc8] sm:$0xff]  ;;  %v107_v39 = vld [vmem:[#allocation8 + $0xd8] sm:$0xff] }
  0x41   :  { %2086 = vmatpush1.bf16.msra.mxu0 %v2085_v23  ;;  %v109_v38 = vld [vmem:[#allocation8 + $0xe8] sm:$0xff]  ;;  %v2121_v40 = vpack.c.bf16 %v102_v35, %v98_v34  ;;  %v111_v42 = vld [vmem:[#allocation8 + $0xf8] sm:$0xff]  ;;  %v104_v43 = vld [vmem:[#allocation8 + $0xc0] sm:$0xff] }
  0x42   :  { %2118 = vmatpush1.bf16.msra.mxu1 %v2117_v27  ;;  %2088 = vmatprep.subr.bf16.mxu0 %v2087_v28  ;;  %v2091_v41 = vpack.c.bf16 %v109_v38, %v105_v37  ;;  %v108_v44 = vld [vmem:[#allocation8 + $0xe0] sm:$0xff]  ;;  %v2123_v45 = vpack.c.bf16 %v111_v42, %v107_v39  ;;  %v106_v46 = vld [vmem:[#allocation8 + $0xd0] sm:$0xff]  ;;  %v113_v48 = vld [vmem:[#allocation8 + $0x108] sm:$0xff] }
  0x43   :  { %2120 = vmatprep.subr.bf16.mxu1 %v2119_v32  ;;  %v110_v47 = vld [vmem:[#allocation8 + $0xf0] sm:$0xff]  ;;  %v117_v49 = vld [vmem:[#allocation8 + $0x128] sm:$0xff]  ;;  %v115_v50 = vld [vmem:[#allocation8 + $0x118] sm:$0xff]  ;;  %v2093_v52 = vpack.c.bf16 %v108_v44, %v104_v43 }
  0x44   :  { %v119_v51 = vld [vmem:[#allocation8 + $0x138] sm:$0xff]  ;;  %v2125_v53 = vpack.c.bf16 %v110_v47, %v106_v46  ;;  %v2095_v54 = vpack.c.bf16 %v117_v49, %v113_v48  ;;  %v112_v55 = vld [vmem:[#allocation8 + $0x100] sm:$0xff]  ;;  %v114_v57 = vld [vmem:[#allocation8 + $0x110] sm:$0xff] }
  0x45   :  { %2090 = vmatpush1.bf16.msra.mxu0 %v2089_v36  ;;  %v116_v56 = vld [vmem:[#allocation8 + $0x120] sm:$0xff]  ;;  %v2127_v58 = vpack.c.bf16 %v119_v51, %v115_v50  ;;  %v118_v59 = vld [vmem:[#allocation8 + $0x130] sm:$0xff]  ;;  %v121_v60 = vld [vmem:[#allocation8 + $0x148] sm:$0xff] }
  0x46   :  { %2122 = vmatpush1.bf16.msra.mxu1 %v2121_v40  ;;  %2092 = vmatprep.subr.bf16.mxu0 %v2091_v41  ;;  %v125_v61 = vld [vmem:[#allocation8 + $0x168] sm:$0xff]  ;;  %v123_v62 = vld [vmem:[#allocation8 + $0x158] sm:$0xff]  ;;  %v2097_v2 = vpack.c.bf16 %v116_v56, %v112_v55  ;;  %v2129_v3 = vpack.c.bf16 %v118_v59, %v114_v57  ;;  %v120_v5 = vld [vmem:[#allocation8 + $0x140] sm:$0xff] }
  0x47   :  { %2124 = vmatprep.subr.bf16.mxu1 %v2123_v45  ;;  %v127_v63 = vld [vmem:[#allocation8 + $0x178] sm:$0xff]  ;;  %v2099_v4 = vpack.c.bf16 %v125_v61, %v121_v60  ;;  %v124_v6 = vld [vmem:[#allocation8 + $0x160] sm:$0xff]  ;;  %v122_v7 = vld [vmem:[#allocation8 + $0x150] sm:$0xff] }
  0x48   :  { %v2131_v8 = vpack.c.bf16 %v127_v63, %v123_v62  ;;  %v126_v9 = vld [vmem:[#allocation8 + $0x170] sm:$0xff]  ;;  %v129_v10 = vld [vmem:[#allocation8 + $0x188] sm:$0xff]  ;;  %v131_v12 = vld [vmem:[#allocation8 + $0x198] sm:$0xff]  ;;  %v2101_v14 = vpack.c.bf16 %v124_v6, %v120_v5 }
  0x49   :  { %2094 = vmatpush1.bf16.msra.mxu0 %v2093_v52  ;;  %v133_v11 = vld [vmem:[#allocation8 + $0x1a8] sm:$0xff]  ;;  %v135_v13 = vld [vmem:[#allocation8 + $0x1b8] sm:$0xff]  ;;  %v2133_v15 = vpack.c.bf16 %v126_v9, %v122_v7  ;;  %v128_v17 = vld [vmem:[#allocation8 + $0x180] sm:$0xff] }
  0x4a   :  { %2126 = vmatpush1.bf16.msra.mxu1 %v2125_v53  ;;  %2096 = vmatprep.subr.bf16.mxu0 %v2095_v54  ;;  %v2103_v16 = vpack.c.bf16 %v133_v11, %v129_v10  ;;  %v132_v18 = vld [vmem:[#allocation8 + $0x1a0] sm:$0xff]  ;;  %v130_v19 = vld [vmem:[#allocation8 + $0x190] sm:$0xff]  ;;  %v2135_v20 = vpack.c.bf16 %v135_v13, %v131_v12  ;;  %v137_v22 = vld [vmem:[#allocation8 + $0x1c8] sm:$0xff] }
  0x4b   :  { %2128 = vmatprep.subr.bf16.mxu1 %v2127_v58  ;;  %v134_v21 = vld [vmem:[#allocation8 + $0x1b0] sm:$0xff]  ;;  %v141_v23 = vld [vmem:[#allocation8 + $0x1e8] sm:$0xff]  ;;  %v139_v24 = vld [vmem:[#allocation8 + $0x1d8] sm:$0xff]  ;;  %v2105_v26 = vpack.c.bf16 %v132_v18, %v128_v17 }
  0x4c   :  { %v143_v25 = vld [vmem:[#allocation8 + $0x1f8] sm:$0xff]  ;;  %v2137_v27 = vpack.c.bf16 %v134_v21, %v130_v19  ;;  %v2107_v28 = vpack.c.bf16 %v141_v23, %v137_v22  ;;  %v136_v29 = vld [vmem:[#allocation8 + $0x1c0] sm:$0xff]  ;;  %v138_v31 = vld [vmem:[#allocation8 + $0x1d0] sm:$0xff] }
  0x4d   :  { %2098 = vmatpush1.bf16.msra.mxu0 %v2097_v2  ;;  %v140_v30 = vld [vmem:[#allocation8 + $0x1e0] sm:$0xff]  ;;  %v2139_v32 = vpack.c.bf16 %v143_v25, %v139_v24  ;;  %v142_v33 = vld [vmem:[#allocation8 + $0x1f0] sm:$0xff]  ;;  %v425_v34 = vld [vmem:[#allocation10 + $0x8] sm:$0xff] }
  0x4e   :  { %2130 = vmatpush1.bf16.msra.mxu1 %v2129_v3  ;;  %2100 = vmatprep.subr.bf16.mxu0 %v2099_v4  ;;  %v429_v35 = vld [vmem:[#allocation10 + $0x28] sm:$0xff]  ;;  %v427_v36 = vld [vmem:[#allocation10 + $0x18] sm:$0xff]  ;;  %v2109_v38 = vpack.c.bf16 %v140_v30, %v136_v29  ;;  %v2141_v39 = vpack.c.bf16 %v142_v33, %v138_v31  ;;  %v424_v41 = vld [vmem:[#allocation10] sm:$0xff] }
  0x4f   :  { %2132 = vmatprep.subr.bf16.mxu1 %v2131_v8  ;;  %v431_v37 = vld [vmem:[#allocation10 + $0x38] sm:$0xff]  ;;  %v3102_v40 = vpack.c.bf16 %v429_v35, %v425_v34  ;;  %v428_v42 = vld [vmem:[#allocation10 + $0x20] sm:$0xff]  ;;  %v426_v44 = vld [vmem:[#allocation10 + $0x10] sm:$0xff] }
  0x50   :  { %v3104_v43 = vpack.c.bf16 %v431_v37, %v427_v36  ;;  %v430_v45 = vld [vmem:[#allocation10 + $0x30] sm:$0xff]  ;;  %v433_v46 = vld [vmem:[#allocation10 + $0x48] sm:$0xff]  ;;  %v72_v48 = vld [vmem:[#allocation5] sm:$0xff]  ;;  %v3106_v49 = vpack.c.bf16 %v428_v42, %v424_v41 }
  0x51   :  { %2102 = vmatpush1.bf16.msra.mxu0 %v2101_v14  ;;  %v437_v47 = vld [vmem:[#allocation10 + $0x68] sm:$0xff]  ;;  %v435_v50 = vld [vmem:[#allocation10 + $0x58] sm:$0xff]  ;;  %v3109_v52 = vpack.c.bf16 %v430_v45, %v426_v44  ;;  %v432_v53 = vld [vmem:[#allocation10 + $0x40] sm:$0xff] }
  0x52   :  { %2134 = vmatpush1.bf16.msra.mxu1 %v2133_v15  ;;  %2104 = vmatprep.subr.bf16.mxu0 %v2103_v16  ;;  %v439_v51 = vld [vmem:[#allocation10 + $0x78] sm:$0xff]  ;;  %v436_v54 = vld [vmem:[#allocation10 + $0x60] sm:$0xff]  ;;  %v3112_v55 = vpack.c.bf16 %v437_v47, %v433_v46  ;;  %v434_v56 = vld [vmem:[#allocation10 + $0x50] sm:$0xff] }
  0x53   :  { %2136 = vmatprep.subr.bf16.mxu1 %v2135_v20  ;;  %v438_v57 = vld [vmem:[#allocation10 + $0x70] sm:$0xff]  ;;  %v3114_v58 = vpack.c.bf16 %v439_v51, %v435_v50  ;;  %v441_v59 = vld [vmem:[#allocation10 + $0x88] sm:$0xff]  ;;  %v3117_v62 = vpack.c.bf16 %v436_v54, %v432_v53  ;;  %v443_v63 = vld [vmem:[#allocation10 + $0x98] sm:$0xff] }
  0x54   :  { %v445_v60 = vld [vmem:[#allocation10 + $0xa8] sm:$0xff]  ;;  %v447_v2 = vld [vmem:[#allocation10 + $0xb8] sm:$0xff]  ;;  %v3121_v3 = vpack.c.bf16 %v438_v57, %v434_v56  ;;  %v440_v4 = vld [vmem:[#allocation10 + $0x80] sm:$0xff] }
  0x55   :  { %2106 = vmatpush1.bf16.msra.mxu0 %v2105_v26  ;;  %v73_v61 = vld [vmem:[#allocation5 + $0x8] sm:$0xff]  ;;  %v444_v5 = vld [vmem:[#allocation10 + $0xa0] sm:$0xff]  ;;  %v3125_v6 = vpack.c.bf16 %v445_v60, %v441_v59  ;;  %v442_v7 = vld [vmem:[#allocation10 + $0x90] sm:$0xff]  ;;  %v3128_v9 = vpack.c.bf16 %v447_v2, %v443_v63 }
  0x56   :  { %2138 = vmatpush1.bf16.msra.mxu1 %v2137_v27  ;;  %2108 = vmatprep.subr.bf16.mxu0 %v2107_v28  ;;  %v446_v8 = vld [vmem:[#allocation10 + $0xb0] sm:$0xff]  ;;  %v449_v10 = vld [vmem:[#allocation10 + $0xc8] sm:$0xff]  ;;  %v3131_v13 = vpack.c.bf16 %v444_v5, %v440_v4  ;;  %v451_v14 = vld [vmem:[#allocation10 + $0xd8] sm:$0xff] }
  0x57   :  { %2140 = vmatprep.subr.bf16.mxu1 %v2139_v32  ;;  %v453_v11 = vld [vmem:[#allocation10 + $0xe8] sm:$0xff]  ;;  %v74_v12 = vld [vmem:[#allocation5 + $0x10] sm:$0xff]  ;;  %v455_v15 = vld [vmem:[#allocation10 + $0xf8] sm:$0xff]  ;;  %v3135_v16 = vpack.c.bf16 %v446_v8, %v442_v7 }
  0x58   :  { %v448_v17 = vld [vmem:[#allocation10 + $0xc0] sm:$0xff]  ;;  %v3139_v19 = vpack.c.bf16 %v453_v11, %v449_v10  ;;  %v450_v20 = vld [vmem:[#allocation10 + $0xd0] sm:$0xff]  ;;  %v3142_v22 = vpack.c.bf16 %v455_v15, %v451_v14  ;;  %v457_v23 = vld [vmem:[#allocation10 + $0x108] sm:$0xff] }
  0x59   :  { %2110 = vmatpush1.bf16.msra.mxu0 %v2109_v38  ;;  %v452_v18 = vld [vmem:[#allocation10 + $0xe0] sm:$0xff]  ;;  %v454_v21 = vld [vmem:[#allocation10 + $0xf0] sm:$0xff]  ;;  %v461_v24 = vld [vmem:[#allocation10 + $0x128] sm:$0xff] }
  0x5a   :  { %2142 = vmatpush1.bf16.msra.mxu1 %v2141_v39  ;;  %2144 = vmatprep.subr.bf16.mxu0 %v3102_v40  ;;  %v75_v25 = vld [vmem:[#allocation5 + $0x18] sm:$0xff]  ;;  %v3145_v26 = vpack.c.bf16 %v452_v18, %v448_v17  ;;  %v3149_v29 = vpack.c.bf16 %v454_v21, %v450_v20  ;;  %v456_v30 = vld [vmem:[#allocation10 + $0x100] sm:$0xff]  ;;  %v3153_v32 = vpack.c.bf16 %v461_v24, %v457_v23  ;;  %v458_v33 = vld [vmem:[#allocation10 + $0x110] sm:$0xff] }
  0x5b   :  { %2176 = vmatprep.subr.bf16.mxu1 %v3104_v43  ;;  %v459_v27 = vld [vmem:[#allocation10 + $0x118] sm:$0xff]  ;;  %v460_v31 = vld [vmem:[#allocation10 + $0x120] sm:$0xff]  ;;  %v462_v34 = vld [vmem:[#allocation10 + $0x130] sm:$0xff] }
  0x5c   :  { %231 = vmatmul.mubr.f32.vlgmr.msra.gmra.mrb[0].mxu0 %v72_v48  ;;  %v463_v28 = vld [vmem:[#allocation10 + $0x138] sm:$0xff]  ;;  %v465_v36 = vld [vmem:[#allocation10 + $0x148] sm:$0xff]  ;;  %v76_v38 = vld [vmem:[#allocation5 + $0x20] sm:$0xff]  ;;  %v3159_v39 = vpack.c.bf16 %v460_v31, %v456_v30  ;;  %v3163_v44 = vpack.c.bf16 %v462_v34, %v458_v33 }
  0x5d   :  { %344 = vmatmul.mubr.f32.vlgmr.msra.gmra.mrb[0].mxu1 %v72_v48  ;;  %2146 = vmatpush1.bf16.msra.mxu0 %v3106_v49  ;;  %v3156_v35 = vpack.c.bf16 %v463_v28, %v459_v27  ;;  %v469_v37 = vld [vmem:[#allocation10 + $0x168] sm:$0xff]  ;;  %v467_v41 = vld [vmem:[#allocation10 + $0x158] sm:$0xff]  ;;  %v464_v45 = vld [vmem:[#allocation10 + $0x140] sm:$0xff] }
  0x5e   :  { %2178 = vmatpush1.bf16.msra.mxu1 %v3109_v52  ;;  %236 = vmatprep.mubr.f32.mxu0 %v3008_v0  ;;  %v471_v42 = vld [vmem:[#allocation10 + $0x178] sm:$0xff]  ;;  %v468_v46 = vld [vmem:[#allocation10 + $0x160] sm:$0xff]  ;;  %v3167_v47 = vpack.c.bf16 %v469_v37, %v465_v36  ;;  %v466_v48 = vld [vmem:[#allocation10 + $0x150] sm:$0xff] }
  0x5f   :  { %349 = vmatprep.mubr.f32.mxu1 %v3008_v0  ;;  %2148 = vmatprep.subr.bf16.mxu0 %v3112_v55  ;;  %v470_v50 = vld [vmem:[#allocation10 + $0x170] sm:$0xff]  ;;  %v3170_v51 = vpack.c.bf16 %v471_v42, %v467_v41  ;;  %v473_v53 = vld [vmem:[#allocation10 + $0x188] sm:$0xff]  ;;  %v3173_v57 = vpack.c.bf16 %v468_v46, %v464_v45  ;;  %v475_v59 = vld [vmem:[#allocation10 + $0x198] sm:$0xff]  ;;  %v146_v41 = vlaneseq }
  0x60   :  { %237 = vmatmul.mubr.f32.gmra.mrb[2].mxu0 %v73_v61  ;;  %2180 = vmatprep.subr.bf16.mxu1 %v3114_v58  ;;  %v477_v54 = vld [vmem:[#allocation10 + $0x1a8] sm:$0xff]  ;;  %v479_v60 = vld [vmem:[#allocation10 + $0x1b8] sm:$0xff]  ;;  %v472_v63 = vld [vmem:[#allocation10 + $0x180] sm:$0xff] }
  0x61   :  { %350 = vmatmul.mubr.f32.gmra.mrb[2].mxu1 %v73_v61  ;;  %2150 = vmatpush1.bf16.msra.mxu0 %v3117_v62  ;;  %v77_v56 = vld [vmem:[#allocation5 + $0x28] sm:$0xff]  ;;  %v3177_v61 = vpack.c.bf16 %v470_v50, %v466_v48  ;;  %v476_v2 = vld [vmem:[#allocation10 + $0x1a0] sm:$0xff]  ;;  %v3181_v4 = vpack.c.bf16 %v477_v54, %v473_v53  ;;  %v474_v5 = vld [vmem:[#allocation10 + $0x190] sm:$0xff]  ;;  %v3184_v8 = vpack.c.bf16 %v479_v60, %v475_v59  ;;  %v147_v42 = vshrl.u32 %v146_v41, 7 }
  0x62   :  { %2182 = vmatpush1.bf16.msra.mxu1 %v3121_v3  ;;  %242 = vmatprep.mubr.f32.mxu0 %v3008_v0  ;;  %v478_v7 = vld [vmem:[#allocation10 + $0x1b0] sm:$0xff]  ;;  %v481_v10 = vld [vmem:[#allocation10 + $0x1c8] sm:$0xff]  ;;  %v3187_v14 = vpack.c.bf16 %v476_v2, %v472_v63  ;;  %v483_v15 = vld [vmem:[#allocation10 + $0x1d8] sm:$0xff] }
  0x63   :  { %355 = vmatprep.mubr.f32.mxu1 %v3008_v0  ;;  %2152 = vmatprep.subr.bf16.mxu0 %v3125_v6  ;;  %v485_v11 = vld [vmem:[#allocation10 + $0x1e8] sm:$0xff]  ;;  %v487_v17 = vld [vmem:[#allocation10 + $0x1f8] sm:$0xff]  ;;  %v3191_v18 = vpack.c.bf16 %v478_v7, %v474_v5  ;;  %v480_v20 = vld [vmem:[#allocation10 + $0x1c0] sm:$0xff]  ;;  %v148_v45 = vsub.s32 0, %v147_v42  ;;  %v152_v48 = vsub.s32 1, %v147_v42 }
  0x64   :  { %243 = vmatmul.mubr.f32.gmra.mrb[4].mxu0 %v74_v12  ;;  %2184 = vmatprep.subr.bf16.mxu1 %v3128_v9  ;;  %v484_v21 = vld [vmem:[#allocation10 + $0x1e0] sm:$0xff]  ;;  %v3200_v24 = vpack.c.bf16 %v485_v11, %v481_v10  ;;  %v486_v27 = vld [vmem:[#allocation10 + $0x1f0] sm:$0xff]  ;;  %v3203_v28 = vpack.c.bf16 %v487_v17, %v483_v15  ;;  %v79_v30 = vld [vmem:[#allocation5 + $0x38] sm:$0xff] }
  0x65   :  { %356 = vmatmul.mubr.f32.gmra.mrb[4].mxu1 %v74_v12  ;;  %2154 = vmatpush1.bf16.msra.mxu0 %v3131_v13  ;;  %v78_v12 = vld [vmem:[#allocation5 + $0x30] sm:$0xff]  ;;  %v3196_v23 = vld [vmem:[%s3631_s4] sm:$0xff]  ;;  %v3206_v31 = vpack.c.bf16 %v484_v21, %v480_v20 }
  0x66   :  { %2186 = vmatpush1.bf16.msra.mxu1 %v3135_v16  ;;  %248 = vmatprep.mubr.f32.mxu0 %v3008_v0  ;;  %vm2048_vm0 = vcmp.gt.s32.totalorder %v3196_v23, 0  ;;  %vm2052_vm1 = vcmp.gt.s32.totalorder %v3196_v23, 1  ;;  %vm2064_vm2 = vcmp.gt.s32.totalorder %v3196_v23, 4  ;;  %vm2072_vm3 = vcmp.gt.s32.totalorder %v3196_v23, 6  ;;  %v144_v46 = vld [vmem:[%s3630_s3] sm:$0xf] }
  0x67   :  { %361 = vmatprep.mubr.f32.mxu1 %v3008_v0  ;;  %2156 = vmatprep.subr.bf16.mxu0 %v3139_v19  ;;  %v668_v34 = vsel %vm2048_vm0, 1, %v3009_v1  ;;  %v855_v36 = vsel %vm2052_vm1, 1, %v3009_v1  ;;  %v1419_v37 = vsel %vm2064_vm2, 1, %v3009_v1  ;;  %v3268_v50 = vrot.slane %v144_v46, %v148_v45  ;;  %s3010_s3 = smov [#allocation12]  }
  0x68   :  { %249 = vmatmul.mubr.f32.gmra.mrb[6].mxu0 %v75_v25  ;;  %2188 = vmatprep.subr.bf16.mxu1 %v3142_v22  ;;  %v3270_v53 = vrot.slane %v144_v46, %v152_v48  ;;  %vm2056_vm5 = vcmp.gt.s32.totalorder %v3196_v23, 2  ;;  %vm2060_vm6 = vcmp.gt.s32.totalorder %v3196_v23, 3  ;;  %vm2068_vm7 = vcmp.gt.s32.totalorder %v3196_v23, 5  ;;  %s2018_s18 = sshll.u32 %s3010_s3, 4  ;;  %s2019_s18 = int_to_ptr.vmem [resolvable:$true] %s2018_s18 }
  0x69   :  { %362 = vmatmul.mubr.f32.gmra.mrb[6].mxu1 %v75_v25  ;;  %2158 = vmatpush1.bf16.msra.mxu0 %v3145_v26  ;;  %v482_v25 = vld [vmem:[#allocation10 + $0x1d0] sm:$0xff]  ;;  %vm2076_vm8 = vcmp.gt.s32.totalorder %v3196_v23, 7  ;;  %s2927_s23 = scalar_lea.vmem %s2019_s18, 128  ;;  %p2932_p11 = scmp.lt.s32.totalorder %s2019_s18, %s2019_s18 }
  0x6a   :  { %2190 = vmatpush1.bf16.msra.mxu1 %v3149_v29  ;;  %254 = vmatprep.mubr.f32.mxu0 %v3008_v0  ;;  %v3211_v33 = vpack.c.bf16 %v486_v27, %v482_v25  ;;  %p2928_p10 = scmp.ne.s32.totalorder %s2019_s18, %s2927_s23  ;;  %p2933_p12 = scmp.lt.s32.totalorder %s2927_s23, %s2927_s23 }
  0x6b   :  { %367 = vmatprep.mubr.f32.mxu1 %v3008_v0  ;;  %2160 = vmatprep.subr.bf16.mxu0 %v3153_v32 }
  0x6c   :  { %255 = vmatmul.mubr.f32.gmra.mrb[8].mxu0 %v76_v38  ;;  %2192 = vmatprep.subr.bf16.mxu1 %v3156_v35  ;;  %p2934_p13 = por %p2933_p12, %p2932_p11 }
  0x6d   :  { %368 = vmatmul.mubr.f32.gmra.mrb[8].mxu1 %v76_v38  ;;  %2162 = vmatpush1.bf16.msra.mxu0 %v3159_v39  ;;  %v1795_v38 = vsel %vm2072_vm3, 1, %v3009_v1 }
  0x6e   :  { %2194 = vmatpush1.bf16.msra.mxu1 %v3163_v44  ;;  %260 = vmatprep.mubr.f32.mxu0 %v3008_v0  ;;  %p2935_p0 = pnand %p2934_p13, %p2928_p10 }
  0x6f   :  { %373 = vmatprep.mubr.f32.mxu1 %v3008_v0  ;;  %2164 = vmatprep.subr.bf16.mxu0 %v3167_v47 }
  0x70   :  { %261 = vmatmul.mubr.f32.gmra.mrb[10].mxu0 %v77_v56  ;;  %2196 = vmatprep.subr.bf16.mxu1 %v3170_v51 }
  0x71   :  { %374 = vmatmul.mubr.f32.gmra.mrb[10].mxu1 %v77_v56  ;;  %2166 = vmatpush1.bf16.msra.mxu0 %v3173_v57  ;;  %v160_v56 = vsub.s32 3, %v147_v42 }
  0x72   :  { %2198 = vmatpush1.bf16.msra.mxu1 %v3177_v61  ;;  %266 = vmatprep.mubr.f32.mxu0 %v3008_v0 }
  0x73   :  { %379 = vmatprep.mubr.f32.mxu1 %v3008_v0  ;;  %2168 = vmatprep.subr.bf16.mxu0 %v3181_v4  ;;  %v3274_v11 = vrot.slane %v144_v46, %v160_v56 }
  0x74   :  { %267 = vmatmul.mubr.f32.gmra.mrb[12].mxu0 %v78_v12  ;;  %2200 = vmatprep.subr.bf16.mxu1 %v3184_v8 }
  0x75   :  { %380 = vmatmul.mubr.f32.gmra.mrb[12].mxu1 %v78_v12  ;;  %2170 = vmatpush1.bf16.msra.mxu0 %v3187_v14  ;;  %v156_v12 = vsub.s32 2, %v147_v42 }
  0x76   :  { %2202 = vmatpush1.bf16.msra.mxu1 %v3191_v18  ;;  %272 = vmatprep.mubr.f32.mxu0 %v3008_v0 }
  0x77   :  { %385 = vmatprep.mubr.f32.mxu1 %v3008_v0  ;;  %2172 = vmatprep.subr.bf16.mxu0 %v3200_v24  ;;  %v3277_v17 = vrot.slane %v144_v46, %v156_v12  ;;  %v1983_v12 = vsel %vm2076_vm8, 1, %v3009_v1 }
  0x78   :  { %273 = vmatmul.mubr.f32.gmra.mrb[14].mxu0 %v79_v30  ;;  %2204 = vmatprep.subr.bf16.mxu1 %v3203_v28 }
  0x79   :  { %386 = vmatmul.mubr.f32.gmra.mrb[14].mxu1 %v79_v30  ;;  %2174 = vmatpush1.bf16.msra.mxu0 %v3206_v31 }
  0x7a   :  { %2206 = vmatpush1.bf16.msra.mxu1 %v3211_v33  ;;  %560 = vmatprep.mubr.f32.mxu0 %v3008_v0 }
  0x7b   :  { %631 = vmatprep.mubr.f32.mxu1 %v3008_v0  ;;  %670 = vperm.xlu0 %2731, %v668_v34  }
  0x7c   :  { %561 = vmatmul.mubr.f32.vlgmr.msra.gmra.mrb[0].mxu0 %v3008_v0  ;;  %2208 = vmatprep.subr.bf16.mxu0 %v3102_v40 }
  0x7d   :  { %632 = vmatmul.mubr.f32.vlgmr.msra.gmra.mrb[0].mxu1 %v3008_v0  ;;  %2240 = vmatprep.subr.bf16.mxu1 %v3104_v43 }
  0x7e   :  { %2210 = vmatpush1.bf16.msra.mxu0 %v3106_v49  ;;  %2242 = vmatpush1.bf16.msra.mxu1 %v3109_v52 }
  0x7f   :  { %857 = vperm.xlu0 %2731, %v855_v36   ;;  %2212 = vmatprep.subr.bf16.mxu0 %v3112_v55 }
  0x80   :  { %2244 = vmatprep.subr.bf16.mxu1 %v3114_v58  ;;  %746 = vmatprep.mubr.f32.mxu0 %v3008_v0 }
  0x81   :  { %817 = vmatprep.mubr.f32.mxu1 %v3008_v0 }
  0x82   :  { %2214 = vmatpush1.bf16.msra.mxu0 %v3117_v62  ;;  %2246 = vmatpush1.bf16.msra.mxu1 %v3121_v3 }
  0x83   :  { %1421 = vperm.xlu0 %2731, %v1419_v37   ;;  %2216 = vmatprep.subr.bf16.mxu0 %v3125_v6 }
  0x84   :  { %2248 = vmatprep.subr.bf16.mxu1 %v3128_v9 }
  0x86   :  { %2218 = vmatpush1.bf16.msra.mxu0 %v3131_v13  ;;  %2250 = vmatpush1.bf16.msra.mxu1 %v3135_v16 }
  0x87   :  { %1797 = vperm.xlu0 %2731, %v1795_v38   ;;  %2220 = vmatprep.subr.bf16.mxu0 %v3139_v19 }
  0x88   :  { %2252 = vmatprep.subr.bf16.mxu1 %v3142_v22 }
  0x8a   :  { %2222 = vmatpush1.bf16.msra.mxu0 %v3145_v26  ;;  %2254 = vmatpush1.bf16.msra.mxu1 %v3149_v29 }
  0x8b   :  { %2224 = vmatprep.subr.bf16.mxu0 %v3153_v32  ;;  %2256 = vmatprep.subr.bf16.mxu1 %v3156_v35 }
  0x8e   :  { %2226 = vmatpush1.bf16.msra.mxu0 %v3159_v39  ;;  %2258 = vmatpush1.bf16.msra.mxu1 %v3163_v44 }
  0x8f   :  { %2228 = vmatprep.subr.bf16.mxu0 %v3167_v47  ;;  %2260 = vmatprep.subr.bf16.mxu1 %v3170_v51 }
  0x92   :  { %2230 = vmatpush1.bf16.msra.mxu0 %v3173_v57  ;;  %2262 = vmatpush1.bf16.msra.mxu1 %v3177_v61 }
  0x93   :  { %2232 = vmatprep.subr.bf16.mxu0 %v3181_v4  ;;  %2264 = vmatprep.subr.bf16.mxu1 %v3184_v8 }
  0x96   :  { %2234 = vmatpush1.bf16.msra.mxu0 %v3187_v14  ;;  %2266 = vmatpush1.bf16.msra.mxu1 %v3191_v18 }
  0x97   :  { %2236 = vmatprep.subr.bf16.mxu0 %v3200_v24  ;;  %2268 = vmatprep.subr.bf16.mxu1 %v3203_v28 }
  0x9a   :  { %2238 = vmatpush1.bf16.msra.mxu0 %v3206_v31  ;;  %2270 = vmatpush1.bf16.msra.mxu1 %v3211_v33 }
  0x9b   :  { %2272 = vmatprep.subr.bf16.mxu0 %v3102_v40  ;;  %2304 = vmatprep.subr.bf16.mxu1 %v3104_v43 }
  0xfa   :  { %v671_v41 = vpop.permute.xlu0 %670 }
  0xfb   :  { %vm672_vm4 = vcmp.eq.s32.totalorder %v671_v41, 1 }
 0x14f   :  { %v562_v54 = vpop.f32.mrb[0].mxu0 }
 0x150   :  { %v2655_v59 = vadd.f32 %v562_v54, %v3268_v50  ;;  %v633_v60 = vpop.f32.mrb[0].mxu1  ;;  %v564_v63 = vpop.f32.mrb[1].mxu0 }
 0x151   :  { %v2656_v2 = vadd.f32 %v564_v63, %v3270_v53  ;;  %v635_v5 = vpop.f32.mrb[1].mxu1  ;;  %v2671_v21 = vadd.f32 %v633_v60, %v3277_v17 }
 0x152   :  { %v2045_v7 = vmul.f32 -1.442695, %v2655_v59  ;;  %v2672_v15 = vadd.f32 %v635_v5, %v3274_v11  ;;  %v1043_v5 = vsel %vm2056_vm5, 1, %v3009_v1 }
 0x153   :  { %v2046_v10 = vmul.f32 -1.442695, %v2656_v2  ;;  %1045 = vperm.xlu1 %2732, %v1043_v5  }
 0x154   :  { %2733 = vpow2.f32 %v2045_v7  ;;  %v2047_v20 = vmul.f32 -1.442695, %v2672_v15  ;;  %v1231_v7 = vsel %vm2060_vm6, 1, %v3009_v1 }
 0x155   :  { %2735 = vpow2.f32 %v2046_v10  ;;  %v1607_v10 = vsel %vm2068_vm7, 1, %v3009_v1 }
 0x156   :  { %2737 = vpow2.f32 %v2047_v20 }
 0x157   :  { %2739 = vtanh.f32 %v2671_v21  ;;  %1233 = vperm.xlu1 %2732, %v1231_v7   ;;  %v858_v7 = vpop.permute.xlu0 %857 }
 0x158   :  { %vm859_vm9 = vcmp.eq.s32.totalorder %v858_v7, 1 }
 0x15b   :  { %1609 = vperm.xlu1 %2732, %v1607_v10  }
 0x15e   :  { %v2734_v25 = vpop.eup %2733 }
 0x15f   :  { %v2736_v27 = vpop.eup %2735  ;;  %v645_v30 = vadd.f32 1.0, %v2734_v25  ;;  %1985 = vperm.xlu1 %2732, %v1983_v12  }
 0x160   :  { %v651_v34 = vadd.f32 1.0, %v2736_v27  ;;  %v2738_v36 = vpop.eup %2737 }
 0x161   :  { %2741 = vrcp.f32 %v645_v30  ;;  %v2740_v37 = vpop.eup %2739  ;;  %v658_v45 = vadd.f32 1.0, %v2738_v36 }
 0x162   :  { %2743 = vrcp.f32 %v651_v34 }
 0x163   :  { %2745 = vrcp.f32 %v658_v45 }
 0x16b   :  { %v2742_v38 = vpop.eup %2741 }
 0x16c   :  { %v2744_v42 = vpop.eup %2743  ;;  %v662_v48 = vmul.f32 %v2742_v38, %v2740_v37 }
 0x16d   :  { %v661_v46 = vmul.f32 0.0, %v2744_v42  ;;  %v2746_v59 = vpop.eup %2745 }
 0x16f   :  { %v663_v54 = vadd.f32 %v662_v48, %v661_v46 }
 0x171   :  { %2747 = vtanh.f32 %v663_v54  ;;  %v3280_v56 = vsel %vm672_vm4, %v663_v54, 0.0 }
 0x17b   :  { %v2748_v60 = vpop.eup %2747 }
 0x17c   :  { %v665_v63 = vmul.f32 %v2748_v60, %v2746_v59 }
 0x17e   :  { %v3282_v2 = vsel %vm672_vm4, %v665_v63, 0.0  ;;  %2077 = vmatmul.mubr.msk.f32.vlgmr.msra.gmra.mrb[2].mxu0 %vm672_vm4, %v665_v63  ;;  %2078 = vmatmul.mubr.msk.f32.vlgmr.msra.gmra.mrb[2].mxu1 %vm672_vm4, %v665_v63 }
 0x17f   :  { %674 = vst [vmem:[#allocation11] sm:$0xff] %v3282_v2  ;;  %2274 = vmatpush1.bf16.msra.mxu0 %v3106_v49  ;;  %2306 = vmatpush1.bf16.msra.mxu1 %v3109_v52 }
 0x180   :  { %2276 = vmatprep.subr.bf16.mxu0 %v3112_v55  ;;  %2308 = vmatprep.subr.bf16.mxu1 %v3114_v58 }
 0x181   :  { %934 = vmatprep.mubr.f32.mxu0 %v3008_v0  ;;  %1005 = vmatprep.mubr.f32.mxu1 %v3008_v0 }
 0x183   :  { %2278 = vmatpush1.bf16.msra.mxu0 %v3117_v62  ;;  %2310 = vmatpush1.bf16.msra.mxu1 %v3121_v3 }
 0x184   :  { %2280 = vmatprep.subr.bf16.mxu0 %v3125_v6  ;;  %2312 = vmatprep.subr.bf16.mxu1 %v3128_v9 }
 0x187   :  { %2282 = vmatpush1.bf16.msra.mxu0 %v3131_v13  ;;  %2314 = vmatpush1.bf16.msra.mxu1 %v3135_v16 }
 0x188   :  { %2284 = vmatprep.subr.bf16.mxu0 %v3139_v19  ;;  %2316 = vmatprep.subr.bf16.mxu1 %v3142_v22 }
 0x18b   :  { %2286 = vmatpush1.bf16.msra.mxu0 %v3145_v26  ;;  %2318 = vmatpush1.bf16.msra.mxu1 %v3149_v29 }
 0x18c   :  { %2288 = vmatprep.subr.bf16.mxu0 %v3153_v32  ;;  %2320 = vmatprep.subr.bf16.mxu1 %v3156_v35 }
 0x18f   :  { %2290 = vmatpush1.bf16.msra.mxu0 %v3159_v39  ;;  %2322 = vmatpush1.bf16.msra.mxu1 %v3163_v44 }
 0x190   :  { %2292 = vmatprep.subr.bf16.mxu0 %v3167_v47  ;;  %2324 = vmatprep.subr.bf16.mxu1 %v3170_v51 }
 0x193   :  { %2294 = vmatpush1.bf16.msra.mxu0 %v3173_v57  ;;  %2326 = vmatpush1.bf16.msra.mxu1 %v3177_v61 }
 0x194   :  { %2296 = vmatprep.subr.bf16.mxu0 %v3181_v4  ;;  %2328 = vmatprep.subr.bf16.mxu1 %v3184_v8 }
 0x197   :  { %2298 = vmatpush1.bf16.msra.mxu0 %v3187_v14  ;;  %2330 = vmatpush1.bf16.msra.mxu1 %v3191_v18 }
 0x198   :  { %2300 = vmatprep.subr.bf16.mxu0 %v3200_v24  ;;  %2332 = vmatprep.subr.bf16.mxu1 %v3203_v28 }
 0x19b   :  { %2302 = vmatpush1.bf16.msra.mxu0 %v3206_v31  ;;  %2334 = vmatpush1.bf16.msra.mxu1 %v3211_v33 }
 0x19c   :  { %2336 = vmatprep.subr.bf16.mxu0 %v3102_v40  ;;  %2368 = vmatprep.subr.bf16.mxu1 %v3104_v43 }
 0x251   :  { %v748_v15 = vpop.f32.mrb[2].mxu0  ;;  %v819_v20 = vpop.f32.mrb[2].mxu1 }
 0x252   :  { %v2657_v21 = vadd.f32 %v748_v15, %v3268_v50  ;;  %v750_v25 = vpop.f32.mrb[3].mxu0  ;;  %v821_v27 = vpop.f32.mrb[3].mxu1  ;;  %v2673_v23 = vadd.f32 %v819_v20, %v3277_v17 }
 0x253   :  { %v2658_v30 = vadd.f32 %v750_v25, %v3270_v53  ;;  %v2674_v37 = vadd.f32 %v821_v27, %v3274_v11 }
 0x254   :  { %v2049_v34 = vmul.f32 -1.442695, %v2657_v21 }
 0x255   :  { %v2050_v36 = vmul.f32 -1.442695, %v2658_v30  ;;  %v2051_v38 = vmul.f32 -1.442695, %v2674_v37 }
 0x256   :  { %2749 = vpow2.f32 %v2049_v34 }
 0x257   :  { %2751 = vpow2.f32 %v2050_v36 }
 0x258   :  { %2753 = vpow2.f32 %v2051_v38 }
 0x259   :  { %2755 = vtanh.f32 %v2673_v23 }
 0x260   :  { %v2750_v41 = vpop.eup %2749 }
 0x261   :  { %v2752_v1 = vpop.eup %2751  ;;  %v831_v42 = vadd.f32 1.0, %v2750_v41 }
 0x262   :  { %v837_v45 = vadd.f32 1.0, %v2752_v1  ;;  %v2754_v48 = vpop.eup %2753 }
 0x263   :  { %2757 = vrcp.f32 %v831_v42  ;;  %v2756_v46 = vpop.eup %2755  ;;  %v844_v63 = vadd.f32 1.0, %v2754_v48 }
 0x264   :  { %2759 = vrcp.f32 %v837_v45 }
 0x265   :  { %2761 = vrcp.f32 %v844_v63 }
 0x26d   :  { %v2758_v54 = vpop.eup %2757 }
 0x26e   :  { %v2760_v59 = vpop.eup %2759  ;;  %v848_v60 = vmul.f32 %v2758_v54, %v2756_v46 }
 0x26f   :  { %v847_v5 = vmul.f32 %v2760_v59, %v3280_v56  ;;  %v2762_v15 = vpop.eup %2761 }
 0x271   :  { %v849_v10 = vadd.f32 %v848_v60, %v847_v5  ;;  %v1046_v5 = vpop.permute.xlu1 %1045 }
 0x272   :  { %vm1047_vm10 = vcmp.eq.s32.totalorder %v1046_v5, 1 }
 0x273   :  { %2763 = vtanh.f32 %v849_v10  ;;  %v3333_v12 = vsel %vm859_vm9, %v849_v10, %v3280_v56 }
 0x27d   :  { %v2764_v20 = vpop.eup %2763 }
 0x27e   :  { %v851_v21 = vmul.f32 %v2764_v20, %v2762_v15 }
 0x280   :  { %v860_v25 = vsel %vm859_vm9, %v851_v21, 0.0  ;;  %v3336_v27 = vsel %vm859_vm9, %v851_v21, %v3282_v2 }
 0x281   :  { %862 = vst [vmem:[#allocation11 + $0x8] sm:$0xff] %v860_v25  ;;  %935 = vmatmul.mubr.f32.vlgmr.msra.gmra.mrb[4].mxu0 %v3336_v27  ;;  %1006 = vmatmul.mubr.f32.vlgmr.msra.gmra.mrb[4].mxu1 %v3336_v27 }
 0x282   :  { %2338 = vmatpush1.bf16.msra.mxu0 %v3106_v49  ;;  %2370 = vmatpush1.bf16.msra.mxu1 %v3109_v52 }
 0x283   :  { %2340 = vmatprep.subr.bf16.mxu0 %v3112_v55  ;;  %2372 = vmatprep.subr.bf16.mxu1 %v3114_v58 }
 0x284   :  { %1122 = vmatprep.mubr.f32.mxu0 %v3008_v0  ;;  %1193 = vmatprep.mubr.f32.mxu1 %v3008_v0 }
 0x286   :  { %2342 = vmatpush1.bf16.msra.mxu0 %v3117_v62  ;;  %2374 = vmatpush1.bf16.msra.mxu1 %v3121_v3 }
 0x287   :  { %2344 = vmatprep.subr.bf16.mxu0 %v3125_v6  ;;  %2376 = vmatprep.subr.bf16.mxu1 %v3128_v9 }
 0x28a   :  { %2346 = vmatpush1.bf16.msra.mxu0 %v3131_v13  ;;  %2378 = vmatpush1.bf16.msra.mxu1 %v3135_v16 }
 0x28b   :  { %2348 = vmatprep.subr.bf16.mxu0 %v3139_v19  ;;  %2380 = vmatprep.subr.bf16.mxu1 %v3142_v22 }
 0x28e   :  { %2350 = vmatpush1.bf16.msra.mxu0 %v3145_v26  ;;  %2382 = vmatpush1.bf16.msra.mxu1 %v3149_v29 }
 0x28f   :  { %2352 = vmatprep.subr.bf16.mxu0 %v3153_v32  ;;  %2384 = vmatprep.subr.bf16.mxu1 %v3156_v35 }
 0x292   :  { %2354 = vmatpush1.bf16.msra.mxu0 %v3159_v39  ;;  %2386 = vmatpush1.bf16.msra.mxu1 %v3163_v44 }
 0x293   :  { %2356 = vmatprep.subr.bf16.mxu0 %v3167_v47  ;;  %2388 = vmatprep.subr.bf16.mxu1 %v3170_v51 }
 0x296   :  { %2358 = vmatpush1.bf16.msra.mxu0 %v3173_v57  ;;  %2390 = vmatpush1.bf16.msra.mxu1 %v3177_v61 }
 0x297   :  { %2360 = vmatprep.subr.bf16.mxu0 %v3181_v4  ;;  %2392 = vmatprep.subr.bf16.mxu1 %v3184_v8 }
 0x29a   :  { %2362 = vmatpush1.bf16.msra.mxu0 %v3187_v14  ;;  %2394 = vmatpush1.bf16.msra.mxu1 %v3191_v18 }
 0x29b   :  { %2364 = vmatprep.subr.bf16.mxu0 %v3200_v24  ;;  %2396 = vmatprep.subr.bf16.mxu1 %v3203_v28 }
 0x29e   :  { %2366 = vmatpush1.bf16.msra.mxu0 %v3206_v31  ;;  %2398 = vmatpush1.bf16.msra.mxu1 %v3211_v33 }
 0x29f   :  { %2400 = vmatprep.subr.bf16.mxu0 %v3102_v40  ;;  %2432 = vmatprep.subr.bf16.mxu1 %v3104_v43 }
 0x354   :  { %v936_v56 = vpop.f32.mrb[4].mxu0  ;;  %v1007_v2 = vpop.f32.mrb[4].mxu1 }
 0x355   :  { %v2659_v30 = vadd.f32 %v936_v56, %v3268_v50  ;;  %v938_v34 = vpop.f32.mrb[5].mxu0  ;;  %v1009_v36 = vpop.f32.mrb[5].mxu1  ;;  %v2675_v42 = vadd.f32 %v1007_v2, %v3277_v17 }
 0x356   :  { %v2660_v37 = vadd.f32 %v938_v34, %v3270_v53  ;;  %v2676_v41 = vadd.f32 %v1009_v36, %v3274_v11 }
 0x357   :  { %v2053_v38 = vmul.f32 -1.442695, %v2659_v30 }
 0x358   :  { %v2054_v23 = vmul.f32 -1.442695, %v2660_v37  ;;  %v2055_v1 = vmul.f32 -1.442695, %v2676_v41 }
 0x359   :  { %2765 = vpow2.f32 %v2053_v38 }
 0x35a   :  { %2767 = vpow2.f32 %v2054_v23 }
 0x35b   :  { %2769 = vpow2.f32 %v2055_v1 }
 0x35c   :  { %2771 = vtanh.f32 %v2675_v42 }
 0x363   :  { %v2766_v45 = vpop.eup %2765 }
 0x364   :  { %v2768_v48 = vpop.eup %2767  ;;  %v1019_v46 = vadd.f32 1.0, %v2766_v45 }
 0x365   :  { %v1025_v54 = vadd.f32 1.0, %v2768_v48  ;;  %v2770_v59 = vpop.eup %2769 }
 0x366   :  { %2773 = vrcp.f32 %v1019_v46  ;;  %v2772_v60 = vpop.eup %2771  ;;  %v1032_v10 = vadd.f32 1.0, %v2770_v59 }
 0x367   :  { %2775 = vrcp.f32 %v1025_v54 }
 0x368   :  { %2777 = vrcp.f32 %v1032_v10 }
 0x370   :  { %v2774_v63 = vpop.eup %2773 }
 0x371   :  { %v2776_v7 = vpop.eup %2775  ;;  %v1036_v15 = vmul.f32 %v2774_v63, %v2772_v60 }
 0x372   :  { %v1035_v20 = vmul.f32 %v2776_v7, %v3333_v12  ;;  %v2778_v56 = vpop.eup %2777 }
 0x374   :  { %v1037_v21 = vadd.f32 %v1036_v15, %v1035_v20 }
 0x376   :  { %2779 = vtanh.f32 %v1037_v21  ;;  %v3380_v25 = vsel %vm1047_vm10, %v1037_v21, %v3333_v12 }
 0x380   :  { %v2780_v2 = vpop.eup %2779 }
 0x381   :  { %v1039_v30 = vmul.f32 %v2780_v2, %v2778_v56  ;;  %v1234_v2 = vpop.permute.xlu1 %1233 }
 0x382   :  { %vm1235_vm11 = vcmp.eq.s32.totalorder %v1234_v2, 1 }
 0x383   :  { %v1048_v34 = vsel %vm1047_vm10, %v1039_v30, 0.0  ;;  %v3383_v36 = vsel %vm1047_vm10, %v1039_v30, %v3336_v27 }
 0x384   :  { %1050 = vst [vmem:[#allocation11 + $0x10] sm:$0xff] %v1048_v34  ;;  %1123 = vmatmul.mubr.f32.vlgmr.msra.gmra.mrb[6].mxu0 %v3383_v36  ;;  %1194 = vmatmul.mubr.f32.vlgmr.msra.gmra.mrb[6].mxu1 %v3383_v36 }
 0x385   :  { %2402 = vmatpush1.bf16.msra.mxu0 %v3106_v49  ;;  %2434 = vmatpush1.bf16.msra.mxu1 %v3109_v52 }
 0x386   :  { %2404 = vmatprep.subr.bf16.mxu0 %v3112_v55  ;;  %2436 = vmatprep.subr.bf16.mxu1 %v3114_v58 }
 0x387   :  { %1310 = vmatprep.mubr.f32.mxu0 %v3008_v0  ;;  %1381 = vmatprep.mubr.f32.mxu1 %v3008_v0 }
 0x389   :  { %2406 = vmatpush1.bf16.msra.mxu0 %v3117_v62  ;;  %2438 = vmatpush1.bf16.msra.mxu1 %v3121_v3 }
 0x38a   :  { %2408 = vmatprep.subr.bf16.mxu0 %v3125_v6  ;;  %2440 = vmatprep.subr.bf16.mxu1 %v3128_v9 }
 0x38d   :  { %2410 = vmatpush1.bf16.msra.mxu0 %v3131_v13  ;;  %2442 = vmatpush1.bf16.msra.mxu1 %v3135_v16 }
 0x38e   :  { %2412 = vmatprep.subr.bf16.mxu0 %v3139_v19  ;;  %2444 = vmatprep.subr.bf16.mxu1 %v3142_v22 }
 0x391   :  { %2414 = vmatpush1.bf16.msra.mxu0 %v3145_v26  ;;  %2446 = vmatpush1.bf16.msra.mxu1 %v3149_v29 }
 0x392   :  { %2416 = vmatprep.subr.bf16.mxu0 %v3153_v32  ;;  %2448 = vmatprep.subr.bf16.mxu1 %v3156_v35 }
 0x395   :  { %2418 = vmatpush1.bf16.msra.mxu0 %v3159_v39  ;;  %2450 = vmatpush1.bf16.msra.mxu1 %v3163_v44 }
 0x396   :  { %2420 = vmatprep.subr.bf16.mxu0 %v3167_v47  ;;  %2452 = vmatprep.subr.bf16.mxu1 %v3170_v51 }
 0x399   :  { %2422 = vmatpush1.bf16.msra.mxu0 %v3173_v57  ;;  %2454 = vmatpush1.bf16.msra.mxu1 %v3177_v61 }
 0x39a   :  { %2424 = vmatprep.subr.bf16.mxu0 %v3181_v4  ;;  %2456 = vmatprep.subr.bf16.mxu1 %v3184_v8 }
 0x39d   :  { %2426 = vmatpush1.bf16.msra.mxu0 %v3187_v14  ;;  %2458 = vmatpush1.bf16.msra.mxu1 %v3191_v18 }
 0x39e   :  { %2428 = vmatprep.subr.bf16.mxu0 %v3200_v24  ;;  %2460 = vmatprep.subr.bf16.mxu1 %v3203_v28 }
 0x3a1   :  { %2430 = vmatpush1.bf16.msra.mxu0 %v3206_v31  ;;  %2462 = vmatpush1.bf16.msra.mxu1 %v3211_v33 }
 0x3a2   :  { %2464 = vmatprep.subr.bf16.mxu0 %v3102_v40  ;;  %2496 = vmatprep.subr.bf16.mxu1 %v3104_v43 }
 0x457   :  { %v1124_v12 = vpop.f32.mrb[6].mxu0  ;;  %v1195_v27 = vpop.f32.mrb[6].mxu1 }
 0x458   :  { %v2661_v37 = vadd.f32 %v1124_v12, %v3268_v50  ;;  %v1126_v38 = vpop.f32.mrb[7].mxu0  ;;  %v1197_v23 = vpop.f32.mrb[7].mxu1  ;;  %v2677_v46 = vadd.f32 %v1195_v27, %v3277_v17 }
 0x459   :  { %v2662_v41 = vadd.f32 %v1126_v38, %v3270_v53  ;;  %v2678_v45 = vadd.f32 %v1197_v23, %v3274_v11 }
 0x45a   :  { %v2057_v1 = vmul.f32 -1.442695, %v2661_v37 }
 0x45b   :  { %v2058_v42 = vmul.f32 -1.442695, %v2662_v41  ;;  %v2059_v48 = vmul.f32 -1.442695, %v2678_v45 }
 0x45c   :  { %2781 = vpow2.f32 %v2057_v1 }
 0x45d   :  { %2783 = vpow2.f32 %v2058_v42 }
 0x45e   :  { %2785 = vpow2.f32 %v2059_v48 }
 0x45f   :  { %2787 = vtanh.f32 %v2677_v46 }
 0x466   :  { %v2782_v54 = vpop.eup %2781 }
 0x467   :  { %v2784_v59 = vpop.eup %2783  ;;  %v1207_v60 = vadd.f32 1.0, %v2782_v54 }
 0x468   :  { %v1213_v63 = vadd.f32 1.0, %v2784_v59  ;;  %v2786_v5 = vpop.eup %2785 }
 0x469   :  { %2789 = vrcp.f32 %v1207_v60  ;;  %v2788_v7 = vpop.eup %2787  ;;  %v1220_v21 = vadd.f32 1.0, %v2786_v5 }
 0x46a   :  { %2791 = vrcp.f32 %v1213_v63 }
 0x46b   :  { %2793 = vrcp.f32 %v1220_v21 }
 0x473   :  { %v2790_v10 = vpop.eup %2789 }
 0x474   :  { %v2792_v15 = vpop.eup %2791  ;;  %v1224_v20 = vmul.f32 %v2790_v10, %v2788_v7 }
 0x475   :  { %v1223_v56 = vmul.f32 %v2792_v15, %v3380_v25  ;;  %v2794_v12 = vpop.eup %2793 }
 0x477   :  { %v1225_v30 = vadd.f32 %v1224_v20, %v1223_v56 }
 0x479   :  { %2795 = vtanh.f32 %v1225_v30  ;;  %v3427_v34 = vsel %vm1235_vm11, %v1225_v30, %v3380_v25 }
 0x483   :  { %v2796_v27 = vpop.eup %2795 }
 0x484   :  { %v1227_v37 = vmul.f32 %v2796_v27, %v2794_v12  ;;  %v1422_v27 = vpop.permute.xlu0 %1421 }
 0x485   :  { %vm1423_vm12 = vcmp.eq.s32.totalorder %v1422_v27, 1 }
 0x486   :  { %v1236_v38 = vsel %vm1235_vm11, %v1227_v37, 0.0  ;;  %v3430_v23 = vsel %vm1235_vm11, %v1227_v37, %v3383_v36 }
 0x487   :  { %1238 = vst [vmem:[#allocation11 + $0x18] sm:$0xff] %v1236_v38  ;;  %1311 = vmatmul.mubr.f32.vlgmr.msra.gmra.mrb[8].mxu0 %v3430_v23  ;;  %1382 = vmatmul.mubr.f32.vlgmr.msra.gmra.mrb[8].mxu1 %v3430_v23 }
 0x488   :  { %2466 = vmatpush1.bf16.msra.mxu0 %v3106_v49  ;;  %2498 = vmatpush1.bf16.msra.mxu1 %v3109_v52 }
 0x489   :  { %2468 = vmatprep.subr.bf16.mxu0 %v3112_v55  ;;  %2500 = vmatprep.subr.bf16.mxu1 %v3114_v58 }
 0x48a   :  { %1498 = vmatprep.mubr.f32.mxu0 %v3008_v0  ;;  %1569 = vmatprep.mubr.f32.mxu1 %v3008_v0 }
 0x48c   :  { %2470 = vmatpush1.bf16.msra.mxu0 %v3117_v62  ;;  %2502 = vmatpush1.bf16.msra.mxu1 %v3121_v3 }
 0x48d   :  { %2472 = vmatprep.subr.bf16.mxu0 %v3125_v6  ;;  %2504 = vmatprep.subr.bf16.mxu1 %v3128_v9 }
 0x490   :  { %2474 = vmatpush1.bf16.msra.mxu0 %v3131_v13  ;;  %2506 = vmatpush1.bf16.msra.mxu1 %v3135_v16 }
 0x491   :  { %2476 = vmatprep.subr.bf16.mxu0 %v3139_v19  ;;  %2508 = vmatprep.subr.bf16.mxu1 %v3142_v22 }
 0x494   :  { %2478 = vmatpush1.bf16.msra.mxu0 %v3145_v26  ;;  %2510 = vmatpush1.bf16.msra.mxu1 %v3149_v29 }
 0x495   :  { %2480 = vmatprep.subr.bf16.mxu0 %v3153_v32  ;;  %2512 = vmatprep.subr.bf16.mxu1 %v3156_v35 }
 0x498   :  { %2482 = vmatpush1.bf16.msra.mxu0 %v3159_v39  ;;  %2514 = vmatpush1.bf16.msra.mxu1 %v3163_v44 }
 0x499   :  { %2484 = vmatprep.subr.bf16.mxu0 %v3167_v47  ;;  %2516 = vmatprep.subr.bf16.mxu1 %v3170_v51 }
 0x49c   :  { %2486 = vmatpush1.bf16.msra.mxu0 %v3173_v57  ;;  %2518 = vmatpush1.bf16.msra.mxu1 %v3177_v61 }
 0x49d   :  { %2488 = vmatprep.subr.bf16.mxu0 %v3181_v4  ;;  %2520 = vmatprep.subr.bf16.mxu1 %v3184_v8 }
 0x4a0   :  { %2490 = vmatpush1.bf16.msra.mxu0 %v3187_v14  ;;  %2522 = vmatpush1.bf16.msra.mxu1 %v3191_v18 }
 0x4a1   :  { %2492 = vmatprep.subr.bf16.mxu0 %v3200_v24  ;;  %2524 = vmatprep.subr.bf16.mxu1 %v3203_v28 }
 0x4a4   :  { %2494 = vmatpush1.bf16.msra.mxu0 %v3206_v31  ;;  %2526 = vmatpush1.bf16.msra.mxu1 %v3211_v33 }
 0x4a5   :  { %2528 = vmatprep.subr.bf16.mxu0 %v3102_v40  ;;  %2560 = vmatprep.subr.bf16.mxu1 %v3104_v43 }
 0x55a   :  { %v1312_v25 = vpop.f32.mrb[8].mxu0  ;;  %v1383_v36 = vpop.f32.mrb[8].mxu1 }
 0x55b   :  { %v2663_v41 = vadd.f32 %v1312_v25, %v3268_v50  ;;  %v1314_v1 = vpop.f32.mrb[9].mxu0  ;;  %v1385_v42 = vpop.f32.mrb[9].mxu1  ;;  %v2679_v60 = vadd.f32 %v1383_v36, %v3277_v17 }
 0x55c   :  { %v2664_v45 = vadd.f32 %v1314_v1, %v3270_v53  ;;  %v2680_v54 = vadd.f32 %v1385_v42, %v3274_v11 }
 0x55d   :  { %v2061_v48 = vmul.f32 -1.442695, %v2663_v41 }
 0x55e   :  { %v2062_v46 = vmul.f32 -1.442695, %v2664_v45  ;;  %v2063_v59 = vmul.f32 -1.442695, %v2680_v54 }
 0x55f   :  { %2797 = vpow2.f32 %v2061_v48 }
 0x560   :  { %2799 = vpow2.f32 %v2062_v46 }
 0x561   :  { %2801 = vpow2.f32 %v2063_v59 }
 0x562   :  { %2803 = vtanh.f32 %v2679_v60 }
 0x569   :  { %v2798_v63 = vpop.eup %2797 }
 0x56a   :  { %v2800_v5 = vpop.eup %2799  ;;  %v1395_v7 = vadd.f32 1.0, %v2798_v63 }
 0x56b   :  { %v1401_v10 = vadd.f32 1.0, %v2800_v5  ;;  %v2802_v15 = vpop.eup %2801 }
 0x56c   :  { %2805 = vrcp.f32 %v1395_v7  ;;  %v2804_v20 = vpop.eup %2803  ;;  %v1408_v30 = vadd.f32 1.0, %v2802_v15 }
 0x56d   :  { %2807 = vrcp.f32 %v1401_v10 }
 0x56e   :  { %2809 = vrcp.f32 %v1408_v30 }
 0x576   :  { %v2806_v21 = vpop.eup %2805 }
 0x577   :  { %v2808_v56 = vpop.eup %2807  ;;  %v1412_v2 = vmul.f32 %v2806_v21, %v2804_v20 }
 0x578   :  { %v1411_v12 = vmul.f32 %v2808_v56, %v3427_v34  ;;  %v2810_v25 = vpop.eup %2809 }
 0x57a   :  { %v1413_v37 = vadd.f32 %v1412_v2, %v1411_v12 }
 0x57c   :  { %2811 = vtanh.f32 %v1413_v37  ;;  %v3474_v38 = vsel %vm1423_vm12, %v1413_v37, %v3427_v34  ;;  %v1610_v37 = vpop.permute.xlu1 %1609 }
 0x57d   :  { %vm1611_vm13 = vcmp.eq.s32.totalorder %v1610_v37, 1 }
 0x586   :  { %v2812_v36 = vpop.eup %2811 }
 0x587   :  { %v1415_v41 = vmul.f32 %v2812_v36, %v2810_v25 }
 0x589   :  { %v1424_v1 = vsel %vm1423_vm12, %v1415_v41, 0.0  ;;  %v3477_v42 = vsel %vm1423_vm12, %v1415_v41, %v3430_v23 }
 0x58a   :  { %1426 = vst [vmem:[#allocation11 + $0x20] sm:$0xff] %v1424_v1  ;;  %1499 = vmatmul.mubr.f32.vlgmr.msra.gmra.mrb[10].mxu0 %v3477_v42  ;;  %1570 = vmatmul.mubr.f32.vlgmr.msra.gmra.mrb[10].mxu1 %v3477_v42 }
 0x58b   :  { %2530 = vmatpush1.bf16.msra.mxu0 %v3106_v49  ;;  %2562 = vmatpush1.bf16.msra.mxu1 %v3109_v52 }
 0x58c   :  { %2532 = vmatprep.subr.bf16.mxu0 %v3112_v55  ;;  %2564 = vmatprep.subr.bf16.mxu1 %v3114_v58 }
 0x58d   :  { %1686 = vmatprep.mubr.f32.mxu0 %v3008_v0  ;;  %1757 = vmatprep.mubr.f32.mxu1 %v3008_v0 }
 0x58f   :  { %2534 = vmatpush1.bf16.msra.mxu0 %v3117_v62  ;;  %2566 = vmatpush1.bf16.msra.mxu1 %v3121_v3 }
 0x590   :  { %2536 = vmatprep.subr.bf16.mxu0 %v3125_v6  ;;  %2568 = vmatprep.subr.bf16.mxu1 %v3128_v9 }
 0x593   :  { %2538 = vmatpush1.bf16.msra.mxu0 %v3131_v13  ;;  %2570 = vmatpush1.bf16.msra.mxu1 %v3135_v16 }
 0x594   :  { %2540 = vmatprep.subr.bf16.mxu0 %v3139_v19  ;;  %2572 = vmatprep.subr.bf16.mxu1 %v3142_v22 }
 0x597   :  { %2542 = vmatpush1.bf16.msra.mxu0 %v3145_v26  ;;  %2574 = vmatpush1.bf16.msra.mxu1 %v3149_v29 }
 0x598   :  { %2544 = vmatprep.subr.bf16.mxu0 %v3153_v32  ;;  %2576 = vmatprep.subr.bf16.mxu1 %v3156_v35 }
 0x59b   :  { %2546 = vmatpush1.bf16.msra.mxu0 %v3159_v39  ;;  %2578 = vmatpush1.bf16.msra.mxu1 %v3163_v44 }
 0x59c   :  { %2548 = vmatprep.subr.bf16.mxu0 %v3167_v47  ;;  %2580 = vmatprep.subr.bf16.mxu1 %v3170_v51 }
 0x59f   :  { %2550 = vmatpush1.bf16.msra.mxu0 %v3173_v57  ;;  %2582 = vmatpush1.bf16.msra.mxu1 %v3177_v61 }
 0x5a0   :  { %2552 = vmatprep.subr.bf16.mxu0 %v3181_v4  ;;  %2584 = vmatprep.subr.bf16.mxu1 %v3184_v8 }
 0x5a3   :  { %2554 = vmatpush1.bf16.msra.mxu0 %v3187_v14  ;;  %2586 = vmatpush1.bf16.msra.mxu1 %v3191_v18 }
 0x5a4   :  { %2556 = vmatprep.subr.bf16.mxu0 %v3200_v24  ;;  %2588 = vmatprep.subr.bf16.mxu1 %v3203_v28 }
 0x5a7   :  { %2558 = vmatpush1.bf16.msra.mxu0 %v3206_v31  ;;  %2590 = vmatpush1.bf16.msra.mxu1 %v3211_v33 }
 0x5a8   :  { %2592 = vmatprep.subr.bf16.mxu0 %v3102_v40  ;;  %2624 = vmatprep.subr.bf16.mxu1 %v3104_v43 }
 0x65d   :  { %v1500_v34 = vpop.f32.mrb[10].mxu0  ;;  %v1571_v23 = vpop.f32.mrb[10].mxu1 }
 0x65e   :  { %v2665_v45 = vadd.f32 %v1500_v34, %v3268_v50  ;;  %v1502_v48 = vpop.f32.mrb[11].mxu0  ;;  %v1573_v46 = vpop.f32.mrb[11].mxu1  ;;  %v2681_v7 = vadd.f32 %v1571_v23, %v3277_v17 }
 0x65f   :  { %v2666_v54 = vadd.f32 %v1502_v48, %v3270_v53  ;;  %v2682_v63 = vadd.f32 %v1573_v46, %v3274_v11 }
 0x660   :  { %v2065_v59 = vmul.f32 -1.442695, %v2665_v45 }
 0x661   :  { %v2066_v60 = vmul.f32 -1.442695, %v2666_v54  ;;  %v2067_v5 = vmul.f32 -1.442695, %v2682_v63 }
 0x662   :  { %2813 = vpow2.f32 %v2065_v59 }
 0x663   :  { %2815 = vpow2.f32 %v2066_v60 }
 0x664   :  { %2817 = vpow2.f32 %v2067_v5 }
 0x665   :  { %2819 = vtanh.f32 %v2681_v7 }
 0x66c   :  { %v2814_v40 = vpop.eup %2813 }
 0x66d   :  { %v2816_v10 = vpop.eup %2815  ;;  %v1583_v43 = vadd.f32 1.0, %v2814_v40 }
 0x66e   :  { %v1589_v15 = vadd.f32 1.0, %v2816_v10  ;;  %v2818_v20 = vpop.eup %2817 }
 0x66f   :  { %2821 = vrcp.f32 %v1583_v43  ;;  %v2820_v21 = vpop.eup %2819  ;;  %v1596_v12 = vadd.f32 1.0, %v2818_v20 }
 0x670   :  { %2823 = vrcp.f32 %v1589_v15 }
 0x671   :  { %2825 = vrcp.f32 %v1596_v12 }
 0x679   :  { %v2822_v56 = vpop.eup %2821 }
 0x67a   :  { %v2824_v2 = vpop.eup %2823  ;;  %v1600_v30 = vmul.f32 %v2822_v56, %v2820_v21 }
 0x67b   :  { %v1599_v27 = vmul.f32 %v2824_v2, %v3474_v38  ;;  %v2826_v41 = vpop.eup %2825 }
 0x67d   :  { %v1601_v25 = vadd.f32 %v1600_v30, %v1599_v27  ;;  %v1986_v30 = vpop.permute.xlu1 %1985 }
 0x67e   :  { %vm1987_vm15 = vcmp.eq.s32.totalorder %v1986_v30, 1 }
 0x67f   :  { %2827 = vtanh.f32 %v1601_v25  ;;  %v3521_v36 = vsel %vm1611_vm13, %v1601_v25, %v3474_v38 }
 0x689   :  { %v2828_v1 = vpop.eup %2827 }
 0x68a   :  { %v1603_v34 = vmul.f32 %v2828_v1, %v2826_v41 }
 0x68c   :  { %v1612_v23 = vsel %vm1611_vm13, %v1603_v34, 0.0  ;;  %v3524_v45 = vsel %vm1611_vm13, %v1603_v34, %v3477_v42 }
 0x68d   :  { %1614 = vst [vmem:[#allocation11 + $0x28] sm:$0xff] %v1612_v23  ;;  %1687 = vmatmul.mubr.f32.vlgmr.msra.gmra.mrb[12].mxu0 %v3524_v45  ;;  %1758 = vmatmul.mubr.f32.vlgmr.msra.gmra.mrb[12].mxu1 %v3524_v45 }
 0x68e   :  { %2594 = vmatpush1.bf16.msra.mxu0 %v3106_v49  ;;  %2626 = vmatpush1.bf16.msra.mxu1 %v3109_v52 }
 0x68f   :  { %2596 = vmatprep.subr.bf16.mxu0 %v3112_v55  ;;  %2628 = vmatprep.subr.bf16.mxu1 %v3114_v58 }
 0x690   :  { %1874 = vmatprep.mubr.f32.mxu0 %v3008_v0  ;;  %1945 = vmatprep.mubr.f32.mxu1 %v3008_v0 }
 0x692   :  { %2598 = vmatpush1.bf16.msra.mxu0 %v3117_v62  ;;  %2630 = vmatpush1.bf16.msra.mxu1 %v3121_v3 }
 0x693   :  { %2600 = vmatprep.subr.bf16.mxu0 %v3125_v6  ;;  %2632 = vmatprep.subr.bf16.mxu1 %v3128_v9 }
 0x696   :  { %2602 = vmatpush1.bf16.msra.mxu0 %v3131_v13  ;;  %2634 = vmatpush1.bf16.msra.mxu1 %v3135_v16 }
 0x697   :  { %2604 = vmatprep.subr.bf16.mxu0 %v3139_v19  ;;  %2636 = vmatprep.subr.bf16.mxu1 %v3142_v22 }
 0x69a   :  { %2606 = vmatpush1.bf16.msra.mxu0 %v3145_v26  ;;  %2638 = vmatpush1.bf16.msra.mxu1 %v3149_v29 }
 0x69b   :  { %2608 = vmatprep.subr.bf16.mxu0 %v3153_v32  ;;  %2640 = vmatprep.subr.bf16.mxu1 %v3156_v35 }
 0x69e   :  { %2610 = vmatpush1.bf16.msra.mxu0 %v3159_v39  ;;  %2642 = vmatpush1.bf16.msra.mxu1 %v3163_v44 }
 0x69f   :  { %2612 = vmatprep.subr.bf16.mxu0 %v3167_v47  ;;  %2644 = vmatprep.subr.bf16.mxu1 %v3170_v51 }
 0x6a2   :  { %2614 = vmatpush1.bf16.msra.mxu0 %v3173_v57  ;;  %2646 = vmatpush1.bf16.msra.mxu1 %v3177_v61  ;;  %v1798_v57 = vpop.permute.xlu0 %1797 }
 0x6a3   :  { %2616 = vmatprep.subr.bf16.mxu0 %v3181_v4  ;;  %2648 = vmatprep.subr.bf16.mxu1 %v3184_v8  ;;  %vm1799_vm14 = vcmp.eq.s32.totalorder %v1798_v57, 1 }
 0x6a6   :  { %2618 = vmatpush1.bf16.msra.mxu0 %v3187_v14  ;;  %2650 = vmatpush1.bf16.msra.mxu1 %v3191_v18 }
 0x6a7   :  { %2620 = vmatprep.subr.bf16.mxu0 %v3200_v24  ;;  %2652 = vmatprep.subr.bf16.mxu1 %v3203_v28 }
 0x6aa   :  { %2622 = vmatpush1.bf16.msra.mxu0 %v3206_v31  ;;  %2654 = vmatpush1.bf16.msra.mxu1 %v3211_v33 }
 0x760   :  { %v1688_v0 = vpop.f32.mrb[12].mxu0  ;;  %v1759_v49 = vpop.f32.mrb[12].mxu1 }
 0x761   :  { %v2667_v52 = vadd.f32 %v1688_v0, %v3268_v50  ;;  %v1690_v55 = vpop.f32.mrb[13].mxu0  ;;  %v1761_v58 = vpop.f32.mrb[13].mxu1  ;;  %v2683_v16 = vadd.f32 %v1759_v49, %v3277_v17 }
 0x762   :  { %v2668_v62 = vadd.f32 %v1690_v55, %v3270_v53  ;;  %v2684_v9 = vadd.f32 %v1761_v58, %v3274_v11 }
 0x763   :  { %v2069_v3 = vmul.f32 -1.442695, %v2667_v52 }
 0x764   :  { %v2070_v6 = vmul.f32 -1.442695, %v2668_v62  ;;  %v2071_v13 = vmul.f32 -1.442695, %v2684_v9 }
 0x765   :  { %2829 = vpow2.f32 %v2069_v3 }
 0x766   :  { %2831 = vpow2.f32 %v2070_v6 }
 0x767   :  { %2833 = vpow2.f32 %v2071_v13 }
 0x768   :  { %2835 = vtanh.f32 %v2683_v16 }
 0x76f   :  { %v2830_v19 = vpop.eup %2829 }
 0x770   :  { %v2832_v22 = vpop.eup %2831  ;;  %v1771_v26 = vadd.f32 1.0, %v2830_v19 }
 0x771   :  { %v1777_v29 = vadd.f32 1.0, %v2832_v22  ;;  %v2834_v32 = vpop.eup %2833 }
 0x772   :  { %2837 = vrcp.f32 %v1771_v26  ;;  %v2836_v35 = vpop.eup %2835  ;;  %v1784_v51 = vadd.f32 1.0, %v2834_v32 }
 0x773   :  { %2839 = vrcp.f32 %v1777_v29 }
 0x774   :  { %2841 = vrcp.f32 %v1784_v51 }
 0x77c   :  { %v2838_v39 = vpop.eup %2837 }
 0x77d   :  { %v2840_v44 = vpop.eup %2839  ;;  %v1788_v47 = vmul.f32 %v2838_v39, %v2836_v35 }
 0x77e   :  { %v1787_v61 = vmul.f32 %v2840_v44, %v3521_v36  ;;  %v2842_v14 = vpop.eup %2841 }
 0x780   :  { %v1789_v4 = vadd.f32 %v1788_v47, %v1787_v61 }
 0x782   :  { %2843 = vtanh.f32 %v1789_v4  ;;  %v1804_v8 = vsel %vm1799_vm14, %v1789_v4, %v3521_v36 }
 0x78c   :  { %v2844_v18 = vpop.eup %2843 }
 0x78d   :  { %v1791_v24 = vmul.f32 %v2844_v18, %v2842_v14 }
 0x78f   :  { %v1800_v28 = vsel %vm1799_vm14, %v1791_v24, 0.0  ;;  %v1803_v31 = vsel %vm1799_vm14, %v1791_v24, %v3524_v45 }
 0x790   :  { %1802 = vst [vmem:[#allocation11 + $0x30] sm:$0xff] %v1800_v28  ;;  %1875 = vmatmul.mubr.f32.vlgmr.msra.gmra.mrb[14].mxu0 %v1803_v31  ;;  %1946 = vmatmul.mubr.f32.vlgmr.msra.gmra.mrb[14].mxu1 %v1803_v31 }
 0x863   :  { %v1876_v33 = vpop.f32.mrb[14].mxu0  ;;  %v1947_v38 = vpop.f32.mrb[14].mxu1 }
 0x864   :  { %v2669_v42 = vadd.f32 %v1876_v33, %v3268_v50  ;;  %v1878_v48 = vpop.f32.mrb[15].mxu0  ;;  %v1949_v46 = vpop.f32.mrb[15].mxu1  ;;  %v2685_v7 = vadd.f32 %v1947_v38, %v3277_v17 }
 0x865   :  { %v2670_v54 = vadd.f32 %v1878_v48, %v3270_v53  ;;  %v2686_v63 = vadd.f32 %v1949_v46, %v3274_v11 }
 0x866   :  { %v2073_v59 = vmul.f32 -1.442695, %v2669_v42 }
 0x867   :  { %v2074_v60 = vmul.f32 -1.442695, %v2670_v54  ;;  %v2075_v5 = vmul.f32 -1.442695, %v2686_v63 }
 0x868   :  { %2845 = vpow2.f32 %v2073_v59 }
 0x869   :  { %2847 = vpow2.f32 %v2074_v60 }
 0x86a   :  { %2849 = vpow2.f32 %v2075_v5 }
 0x86b   :  { %2851 = vtanh.f32 %v2685_v7 }
 0x872   :  { %v2846_v40 = vpop.eup %2845 }
 0x873   :  { %v2848_v10 = vpop.eup %2847  ;;  %v1959_v43 = vadd.f32 1.0, %v2846_v40 }
 0x874   :  { %v1965_v15 = vadd.f32 1.0, %v2848_v10  ;;  %v2850_v50 = vpop.eup %2849 }
 0x875   :  { %2853 = vrcp.f32 %v1959_v43  ;;  %v2852_v20 = vpop.eup %2851  ;;  %v1972_v2 = vadd.f32 1.0, %v2850_v50 }
 0x876   :  { %2855 = vrcp.f32 %v1965_v15 }
 0x877   :  { %2857 = vrcp.f32 %v1972_v2 }
 0x87f   :  { %v2854_v53 = vpop.eup %2853 }
 0x880   :  { %v2856_v21 = vpop.eup %2855  ;;  %v1976_v56 = vmul.f32 %v2854_v53, %v2852_v20 }
 0x881   :  { %v1975_v12 = vmul.f32 %v2856_v21, %v1804_v8  ;;  %v2858_v27 = vpop.eup %2857 }
 0x883   :  { %v1977_v11 = vadd.f32 %v1976_v56, %v1975_v12 }
 0x885   :  { %2859 = vtanh.f32 %v1977_v11  ;;  %v1992_v17 = vsel %vm1987_vm15, %v1977_v11, %v1804_v8 }
 0x886   :  { %1999 = vst [vmem:[#allocation14] sm:$0xff] %v1992_v17 }
 0x88f   :  { %v2860_v37 = vpop.eup %2859 }
 0x890   :  { %v1979_v25 = vmul.f32 %v2860_v37, %v2858_v27 }
 0x892   :  { %v1988_v36 = vsel %vm1987_vm15, %v1979_v25, 0.0  ;;  %v1991_v41 = vsel %vm1987_vm15, %v1979_v25, %v1803_v31 }
 0x893   :  { %1990 = vst [vmem:[#allocation11 + $0x38] sm:$0xff] %v1988_v36  ;;  %1998 = vst [vmem:[#allocation12] sm:$0xff] %v1991_v41 }
 0x894   :  { %2938 = shalt.err (!%p2935_p0)
}
 0x895   :  { %s2939_s27 = scalar_lea.hbm %s3633_s6, 128 }
 0x896   :  { %p2940_p1 = scmp.ne.s32.totalorder %s3633_s6, %s2939_s27  ;;  %p2943_p2 = scmp.lt.u32.totalorder %s2939_s27, %s3633_s6 }
 0x898   :  { %p2945_p3 = pnand %p2943_p2, %p2940_p1 }
 0x89a   :  { %2948 = shalt.err (!%p2945_p3)
}
 0x89b   :  { %2021 = dma.vmem_to_hbm [thread:$0]  %s2019_s18, 128, %s3633_s6, [#allocation13]  }
 0x89c   :  { %s2949_s13 = scalar_lea.vmem %s3574_s20, 1024  ;;  %p2954_p5 = scmp.lt.s32.totalorder %s3574_s20, %s3574_s20 }
 0x89d   :  { %p2950_p4 = scmp.ne.s32.totalorder %s3574_s20, %s2949_s13  ;;  %p2955_p6 = scmp.lt.s32.totalorder %s2949_s13, %s2949_s13 }
 0x89f   :  { %p2956_p7 = por %p2955_p6, %p2954_p5 }
 0x8a1   :  { %p2957_p8 = pnand %p2956_p7, %p2950_p4 }
 0x8a3   :  { %2960 = shalt.err (!%p2957_p8)
}
 0x8a4   :  { %s2961_s17 = scalar_lea.hbm %s3632_s5, 1024 }
 0x8a5   :  { %p2962_p9 = scmp.ne.s32.totalorder %s3632_s5, %s2961_s17  ;;  %p2965_p10 = scmp.lt.u32.totalorder %s2961_s17, %s3632_s5 }
 0x8a7   :  { %p2967_p11 = pnand %p2965_p10, %p2962_p9 }
 0x8a9   :  { %2970 = shalt.err (!%p2967_p11)
}
 0x8aa   :  { %2011 = dma.vmem_to_hbm [thread:$0]  %s3574_s20, 1024, %s3632_s5, [#allocation7], %s3005_s1, %s3005_s1, %s3006_s25  }
 0x8ab   :  { %s2971_s12 = scalar_lea.vmem %s3576_s22, 128  ;;  %p2976_p13 = scmp.lt.s32.totalorder %s3576_s22, %s3576_s22 }
 0x8ac   :  { %p2972_p12 = scmp.ne.s32.totalorder %s3576_s22, %s2971_s12  ;;  %p2977_p0 = scmp.lt.s32.totalorder %s2971_s12, %s2971_s12 }
 0x8ae   :  { %p2978_p1 = por %p2977_p0, %p2976_p13 }
 0x8b0   :  { %p2979_p2 = pnand %p2978_p1, %p2972_p12 }
 0x8b2   :  { %2982 = shalt.err (!%p2979_p2)
}
 0x8b3   :  { %s2983_s19 = scalar_lea.hbm %s3634_s7, 128 }
 0x8b4   :  { %p2984_p3 = scmp.ne.s32.totalorder %s3634_s7, %s2983_s19  ;;  %p2987_p4 = scmp.lt.u32.totalorder %s2983_s19, %s3634_s7 }
 0x8b6   :  { %p2989_p5 = pnand %p2987_p4, %p2984_p3 }
 0x8b8   :  { %2992 = shalt.err (!%p2989_p5)
}
 0x8b9   :  { %2031 = dma.vmem_to_hbm [thread:$0]  %s3576_s22, 128, %s3634_s7, [#allocation13]  }
 0x8ba   :  { %2997 = dma.done.wait [#allocation7], 1024  }
 0x8bb   :  { %2998 = vsyncadd [#allocation7], 4294966272 }
 0x8bc   :  { %2999 = dma.done.wait [#allocation13], 256  }
 0x8bd   :  { %3000 = vsyncadd [#allocation13], 4294967040 }
 0x8be   :  { %2041 = vsyncpa [#allocation6], 1 }
 0x8bf   :  { %2042 = vsyncpa [#allocation9], 1 }
 0x8c0   :  { %2043 = vsyncpa [#allocation7], 1 }
 0x8c1   :  { %2044 = vsyncpa [#allocation13], 1 }

</bundles_post_ra>
